<compile_context>
chip_gen: v7x
topology: tpu7x:2x2x1
jax: 0.10.0
libtpu: 0.0.40
codegen_flags: <defaults>
</compile_context>

<pallas_src>
import functools
import math

import jax
import jax.numpy as jnp
from jax.experimental import pallas as pl
from jax.experimental.pallas import tpu as pltpu


# ----------------------------------------------------------------------------
# Fully fused generator forward kernel
# ----------------------------------------------------------------------------
def _generator_kernel(noise_ref, cls_ref,
                      w0n_ref,
                      w1_ref, g1_ref, be1_ref,
                      w2_ref, g2_ref, be2_ref,
                      w3_ref, g3_ref, be3_ref,
                      w4_ref, b4_ref,
                      o_ref, *, eps: float):
    def leaky(z):
        return jnp.maximum(z, 0.2 * z)                      # LeakyReLU(0.2)

    # --- block 0: Linear(nc+latent -> 128) + LeakyReLU (no BN) --------------
    # cat([emb(labels), noise]) @ W0 + b0
    #   == noise @ W0[nc:]  +  (emb(labels) @ W0[:nc] + b0)
    # the second term is precomputed in the wrapper as cls_ref (B, 128).
    y = (jnp.dot(noise_ref[...].astype(jnp.bfloat16), w0n_ref[...],
                 preferred_element_type=jnp.float32)
         + cls_ref[...])
    y = leaky(y)

    # --- blocks 1..3: Linear (no bias: cancelled by BN) + BN + LeakyReLU ----
    def bn_block(x, w_ref, g_ref, beta_ref):
        z = jnp.dot(x.astype(jnp.bfloat16), w_ref[...],
                    preferred_element_type=jnp.float32)
        mean = jnp.mean(z, axis=0, keepdims=True)            # (1, fout)
        mean_sq = jnp.mean(z * z, axis=0, keepdims=True)
        var = mean_sq - mean * mean                          # biased batch var
        scale = g_ref[...] * jax.lax.rsqrt(var + eps)        # (1, fout)
        shift = beta_ref[...] - mean * scale                 # (1, fout)
        return leaky(z * scale + shift)

    y = bn_block(y, w1_ref, g1_ref, be1_ref)
    y = bn_block(y, w2_ref, g2_ref, be2_ref)
    y = bn_block(y, w3_ref, g3_ref, be3_ref)

    # --- final: Linear(1024 -> out_pad) + Tanh (lane-dense padded store) ----
    y = jnp.dot(y.astype(jnp.bfloat16), w4_ref[...],
                preferred_element_type=jnp.float32) + b4_ref[...]
    o_ref[...] = jnp.tanh(y)


# ----------------------------------------------------------------------------
# Generator: parameters + forward
# ----------------------------------------------------------------------------
def init_generator_params(key, latent_dim, num_classes, img_shape):
    """Deterministic init mirroring the PyTorch module's parameter shapes."""
    out_dim = int(math.prod(img_shape))
    dims = [latent_dim + num_classes, 128, 256, 512, 1024, out_dim]

    params = {}
    key, k_emb = jax.random.split(key)
    # nn.Embedding default init: N(0, 1)
    params["label_emb"] = jax.random.normal(k_emb, (num_classes, num_classes),
                                            jnp.float32)

    layers = []
    for li in range(len(dims) - 1):
        fin, fout = dims[li], dims[li + 1]
        key, kw, kb = jax.random.split(key, 3)
        bound = 1.0 / math.sqrt(fin)
        w = jax.random.uniform(kw, (fin, fout), jnp.float32, -bound, bound)
        b = jax.random.uniform(kb, (1, fout), jnp.float32, -bound, bound)
        layer = {"w": w, "b": b}
        # BN on blocks 128->256, 256->512, 512->1024
        if li in (1, 2, 3):
            layer["gamma"] = jnp.ones((1, fout), jnp.float32)
            layer["beta"] = jnp.zeros((1, fout), jnp.float32)
        layers.append(layer)
    params["layers"] = layers
    return params


def generator_forward(params, noise, labels):
    emb_table = params["label_emb"]                          # (nc, nc) f32
    nc = emb_table.shape[0]
    B, latent_dim = noise.shape
    L = params["layers"]

    # --- fold the embedding + first-layer split out of the kernel -----------
    # class_bias[c] = emb_table[c] @ W0[:nc] + b0   -> (nc, 128), f32, tiny.
    w0 = L[0]["w"]
    class_bias = jnp.dot(emb_table, w0[:nc]) + L[0]["b"]     # (nc, 128)
    cls_add = jnp.take(class_bias, labels.astype(jnp.int32), axis=0)  # (B,128)
    w0n = w0[nc:].astype(jnp.bfloat16)                       # (latent, 128)

    # --- pad the final output feature dim to a multiple of 128 --------------
    out_dim = L[4]["w"].shape[1]
    out_pad = ((out_dim + 127) // 128) * 128
    w4 = L[4]["w"]
    b4 = L[4]["b"]
    if out_pad != out_dim:
        w4 = jnp.pad(w4, ((0, 0), (0, out_pad - out_dim)))
        b4 = jnp.pad(b4, ((0, 0), (0, out_pad - out_dim)))

    inputs = (
        noise.astype(jnp.float32),
        cls_add.astype(jnp.float32),
        w0n,
        L[1]["w"].astype(jnp.bfloat16), L[1]["gamma"], L[1]["beta"],
        L[2]["w"].astype(jnp.bfloat16), L[2]["gamma"], L[2]["beta"],
        L[3]["w"].astype(jnp.bfloat16), L[3]["gamma"], L[3]["beta"],
        w4.astype(jnp.bfloat16), b4.astype(jnp.float32),
    )

    # --- VMEM budget + cost estimate -----------------------------------------
    in_bytes = sum(int(x.size) * x.dtype.itemsize for x in inputs)
    act_bytes = B * (128 + 256 + 512 + 1024) * 4
    out_bytes = B * out_pad * 4
    vmem_need = in_bytes + 2 * act_bytes + 2 * out_bytes + (4 << 20)
    vmem_limit = int(min(max(vmem_need, 32 << 20), 64 << 20))

    flops = 2 * B * (latent_dim * 128 + 128 * 256 + 256 * 512
                     + 512 * 1024 + 1024 * out_pad)
    cost = pl.CostEstimate(
        flops=flops,
        transcendentals=B * out_pad + 3 * 1024,              # tanh + BN rsqrt
        bytes_accessed=in_bytes + out_bytes,
    )

    kernel = functools.partial(_generator_kernel, eps=0.8)
    vmem_spec = pl.BlockSpec(memory_space=pltpu.MemorySpace.VMEM)

    out = pl.pallas_call(
        kernel,
        out_shape=jax.ShapeDtypeStruct((B, out_pad), jnp.float32),
        in_specs=[vmem_spec] * len(inputs),
        out_specs=vmem_spec,
        compiler_params=pltpu.CompilerParams(vmem_limit_bytes=vmem_limit),
        cost_estimate=cost,
    )(*inputs)

    return out[:, :out_dim]


if __name__ == "__main__":
    # Small, module-consistent shapes.
    batch = 8
    latent_dim = 32
    num_classes = 10
    img_shape = (1, 16, 16)  # -> output dim 256 (already lane-dense)

    key = jax.random.PRNGKey(0)
    key, k_params, k_noise, k_labels = jax.random.split(key, 4)

    params = init_generator_params(k_params, latent_dim, num_classes, img_shape)
    noise = jax.random.normal(k_noise, (batch, latent_dim), jnp.float32)
    labels = jax.random.randint(k_labels, (batch,), 0, num_classes, jnp.int32)

    fwd = jax.jit(generator_forward)
    img = fwd(params, noise, labels)
    jax.block_until_ready(img)

    assert img.shape == (batch, int(math.prod(img_shape)))
    assert img.dtype == jnp.float32
    assert bool(jnp.all(jnp.isfinite(img)))
    assert bool(jnp.all(jnp.abs(img) <= 1.0))  # tanh output range

    print("KERNEL_OK")
</pallas_src>

<mosaic_0001>
module attributes {stable_mosaic.version = 11 : i64} {
  func.func @_generator_kernel(%arg0: memref<8x32xf32, #tpu.memory_space<vmem>>, %arg1: memref<8x128xf32, #tpu.memory_space<vmem>>, %arg2: memref<32x128xbf16, #tpu.memory_space<vmem>>, %arg3: memref<128x256xbf16, #tpu.memory_space<vmem>>, %arg4: memref<1x256xf32, #tpu.memory_space<vmem>>, %arg5: memref<1x256xf32, #tpu.memory_space<vmem>>, %arg6: memref<256x512xbf16, #tpu.memory_space<vmem>>, %arg7: memref<1x512xf32, #tpu.memory_space<vmem>>, %arg8: memref<1x512xf32, #tpu.memory_space<vmem>>, %arg9: memref<512x1024xbf16, #tpu.memory_space<vmem>>, %arg10: memref<1x1024xf32, #tpu.memory_space<vmem>>, %arg11: memref<1x1024xf32, #tpu.memory_space<vmem>>, %arg12: memref<1024x256xbf16, #tpu.memory_space<vmem>>, %arg13: memref<1x256xf32, #tpu.memory_space<vmem>>, %arg14: memref<8x256xf32, #tpu.memory_space<vmem>>) attributes {dimension_semantics = [], scalar_prefetch = 0 : i64, scratch_operands = 0 : i64, tpu.core_type = #tpu.core_type<tc>} {
    %c0 = arith.constant 0 : index
    %c0_0 = arith.constant 0 : index
    %0 = vector.load %arg0[%c0, %c0_0] : memref<8x32xf32, #tpu.memory_space<vmem>>, vector<8x32xf32>
    %1 = arith.truncf %0 : vector<8x32xf32> to vector<8x32xbf16>
    %c0_1 = arith.constant 0 : index
    %c0_2 = arith.constant 0 : index
    %2 = vector.load %arg2[%c0_1, %c0_2] : memref<32x128xbf16, #tpu.memory_space<vmem>>, vector<32x128xbf16>
    %cst = arith.constant dense<0.000000e+00> : vector<8x128xf32>
    %3 = tpu.matmul %1, %2, %cst {dimension_numbers = #tpu.dot_dimension_numbers<[1], [0], [0], [1], [0, 0, 1, 1], [], []>} : vector<8x32xbf16>, vector<32x128xbf16>, vector<8x128xf32> -> vector<8x128xf32>
    %c0_3 = arith.constant 0 : index
    %c0_4 = arith.constant 0 : index
    %4 = vector.load %arg1[%c0_3, %c0_4] : memref<8x128xf32, #tpu.memory_space<vmem>>, vector<8x128xf32>
    %5 = arith.addf %3, %4 : vector<8x128xf32>
    %cst_5 = arith.constant 2.000000e-01 : f32
    %6 = vector.broadcast %cst_5 : f32 to vector<8x128xf32>
    %7 = arith.mulf %6, %5 : vector<8x128xf32>
    %8 = arith.maximumf %5, %7 : vector<8x128xf32>
    %9 = arith.truncf %8 : vector<8x128xf32> to vector<8x128xbf16>
    %c0_6 = arith.constant 0 : index
    %c0_7 = arith.constant 0 : index
    %10 = vector.load %arg3[%c0_6, %c0_7] : memref<128x256xbf16, #tpu.memory_space<vmem>>, vector<128x256xbf16>
    %cst_8 = arith.constant dense<0.000000e+00> : vector<8x256xf32>
    %11 = tpu.matmul %9, %10, %cst_8 {dimension_numbers = #tpu.dot_dimension_numbers<[1], [0], [0], [1], [0, 0, 1, 1], [], []>} : vector<8x128xbf16>, vector<128x256xbf16>, vector<8x256xf32> -> vector<8x256xf32>
    %cst_9 = arith.constant dense<0.000000e+00> : vector<256xf32>
    %12 = vector.multi_reduction <add>, %11, %cst_9 [0] : vector<8x256xf32> to vector<256xf32>
    %13 = vector.shape_cast %12 : vector<256xf32> to vector<1x256xf32>
    %cst_10 = arith.constant 8.000000e+00 : f32
    %14 = vector.broadcast %cst_10 : f32 to vector<1x256xf32>
    %15 = arith.divf %13, %14 : vector<1x256xf32>
    %16 = arith.mulf %11, %11 : vector<8x256xf32>
    %cst_11 = arith.constant dense<0.000000e+00> : vector<256xf32>
    %17 = vector.multi_reduction <add>, %16, %cst_11 [0] : vector<8x256xf32> to vector<256xf32>
    %18 = vector.shape_cast %17 : vector<256xf32> to vector<1x256xf32>
    %cst_12 = arith.constant 8.000000e+00 : f32
    %19 = vector.broadcast %cst_12 : f32 to vector<1x256xf32>
    %20 = arith.divf %18, %19 : vector<1x256xf32>
    %21 = arith.mulf %15, %15 : vector<1x256xf32>
    %22 = arith.subf %20, %21 : vector<1x256xf32>
    %c0_13 = arith.constant 0 : index
    %c0_14 = arith.constant 0 : index
    %23 = vector.load %arg4[%c0_13, %c0_14] : memref<1x256xf32, #tpu.memory_space<vmem>>, vector<1x256xf32>
    %cst_15 = arith.constant 8.000000e-01 : f32
    %24 = vector.broadcast %cst_15 : f32 to vector<1x256xf32>
    %25 = arith.addf %22, %24 : vector<1x256xf32>
    %26 = math.rsqrt %25 : vector<1x256xf32>
    %27 = arith.mulf %23, %26 : vector<1x256xf32>
    %c0_16 = arith.constant 0 : index
    %c0_17 = arith.constant 0 : index
    %28 = vector.load %arg5[%c0_16, %c0_17] : memref<1x256xf32, #tpu.memory_space<vmem>>, vector<1x256xf32>
    %29 = arith.mulf %15, %27 : vector<1x256xf32>
    %30 = arith.subf %28, %29 : vector<1x256xf32>
    %31 = vector.broadcast %27 : vector<1x256xf32> to vector<8x256xf32>
    %32 = arith.mulf %11, %31 : vector<8x256xf32>
    %33 = vector.broadcast %30 : vector<1x256xf32> to vector<8x256xf32>
    %34 = arith.addf %32, %33 : vector<8x256xf32>
    %cst_18 = arith.constant 2.000000e-01 : f32
    %35 = vector.broadcast %cst_18 : f32 to vector<8x256xf32>
    %36 = arith.mulf %35, %34 : vector<8x256xf32>
    %37 = arith.maximumf %34, %36 : vector<8x256xf32>
    %38 = arith.truncf %37 : vector<8x256xf32> to vector<8x256xbf16>
    %c0_19 = arith.constant 0 : index
    %c0_20 = arith.constant 0 : index
    %39 = vector.load %arg6[%c0_19, %c0_20] : memref<256x512xbf16, #tpu.memory_space<vmem>>, vector<256x512xbf16>
    %cst_21 = arith.constant dense<0.000000e+00> : vector<8x512xf32>
    %40 = tpu.matmul %38, %39, %cst_21 {dimension_numbers = #tpu.dot_dimension_numbers<[1], [0], [0], [1], [0, 0, 1, 1], [], []>} : vector<8x256xbf16>, vector<256x512xbf16>, vector<8x512xf32> -> vector<8x512xf32>
    %cst_22 = arith.constant dense<0.000000e+00> : vector<512xf32>
    %41 = vector.multi_reduction <add>, %40, %cst_22 [0] : vector<8x512xf32> to vector<512xf32>
    %42 = vector.shape_cast %41 : vector<512xf32> to vector<1x512xf32>
    %cst_23 = arith.constant 8.000000e+00 : f32
    %43 = vector.broadcast %cst_23 : f32 to vector<1x512xf32>
    %44 = arith.divf %42, %43 : vector<1x512xf32>
    %45 = arith.mulf %40, %40 : vector<8x512xf32>
    %cst_24 = arith.constant dense<0.000000e+00> : vector<512xf32>
    %46 = vector.multi_reduction <add>, %45, %cst_24 [0] : vector<8x512xf32> to vector<512xf32>
    %47 = vector.shape_cast %46 : vector<512xf32> to vector<1x512xf32>
    %cst_25 = arith.constant 8.000000e+00 : f32
    %48 = vector.broadcast %cst_25 : f32 to vector<1x512xf32>
    %49 = arith.divf %47, %48 : vector<1x512xf32>
    %50 = arith.mulf %44, %44 : vector<1x512xf32>
    %51 = arith.subf %49, %50 : vector<1x512xf32>
    %c0_26 = arith.constant 0 : index
    %c0_27 = arith.constant 0 : index
    %52 = vector.load %arg7[%c0_26, %c0_27] : memref<1x512xf32, #tpu.memory_space<vmem>>, vector<1x512xf32>
    %cst_28 = arith.constant 8.000000e-01 : f32
    %53 = vector.broadcast %cst_28 : f32 to vector<1x512xf32>
    %54 = arith.addf %51, %53 : vector<1x512xf32>
    %55 = math.rsqrt %54 : vector<1x512xf32>
    %56 = arith.mulf %52, %55 : vector<1x512xf32>
    %c0_29 = arith.constant 0 : index
    %c0_30 = arith.constant 0 : index
    %57 = vector.load %arg8[%c0_29, %c0_30] : memref<1x512xf32, #tpu.memory_space<vmem>>, vector<1x512xf32>
    %58 = arith.mulf %44, %56 : vector<1x512xf32>
    %59 = arith.subf %57, %58 : vector<1x512xf32>
    %60 = vector.broadcast %56 : vector<1x512xf32> to vector<8x512xf32>
    %61 = arith.mulf %40, %60 : vector<8x512xf32>
    %62 = vector.broadcast %59 : vector<1x512xf32> to vector<8x512xf32>
    %63 = arith.addf %61, %62 : vector<8x512xf32>
    %cst_31 = arith.constant 2.000000e-01 : f32
    %64 = vector.broadcast %cst_31 : f32 to vector<8x512xf32>
    %65 = arith.mulf %64, %63 : vector<8x512xf32>
    %66 = arith.maximumf %63, %65 : vector<8x512xf32>
    %67 = arith.truncf %66 : vector<8x512xf32> to vector<8x512xbf16>
    %c0_32 = arith.constant 0 : index
    %c0_33 = arith.constant 0 : index
    %68 = vector.load %arg9[%c0_32, %c0_33] : memref<512x1024xbf16, #tpu.memory_space<vmem>>, vector<512x1024xbf16>
    %cst_34 = arith.constant dense<0.000000e+00> : vector<8x1024xf32>
    %69 = tpu.matmul %67, %68, %cst_34 {dimension_numbers = #tpu.dot_dimension_numbers<[1], [0], [0], [1], [0, 0, 1, 1], [], []>} : vector<8x512xbf16>, vector<512x1024xbf16>, vector<8x1024xf32> -> vector<8x1024xf32>
    %cst_35 = arith.constant dense<0.000000e+00> : vector<1024xf32>
    %70 = vector.multi_reduction <add>, %69, %cst_35 [0] : vector<8x1024xf32> to vector<1024xf32>
    %71 = vector.shape_cast %70 : vector<1024xf32> to vector<1x1024xf32>
    %cst_36 = arith.constant 8.000000e+00 : f32
    %72 = vector.broadcast %cst_36 : f32 to vector<1x1024xf32>
    %73 = arith.divf %71, %72 : vector<1x1024xf32>
    %74 = arith.mulf %69, %69 : vector<8x1024xf32>
    %cst_37 = arith.constant dense<0.000000e+00> : vector<1024xf32>
    %75 = vector.multi_reduction <add>, %74, %cst_37 [0] : vector<8x1024xf32> to vector<1024xf32>
    %76 = vector.shape_cast %75 : vector<1024xf32> to vector<1x1024xf32>
    %cst_38 = arith.constant 8.000000e+00 : f32
    %77 = vector.broadcast %cst_38 : f32 to vector<1x1024xf32>
    %78 = arith.divf %76, %77 : vector<1x1024xf32>
    %79 = arith.mulf %73, %73 : vector<1x1024xf32>
    %80 = arith.subf %78, %79 : vector<1x1024xf32>
    %c0_39 = arith.constant 0 : index
    %c0_40 = arith.constant 0 : index
    %81 = vector.load %arg10[%c0_39, %c0_40] : memref<1x1024xf32, #tpu.memory_space<vmem>>, vector<1x1024xf32>
    %cst_41 = arith.constant 8.000000e-01 : f32
    %82 = vector.broadcast %cst_41 : f32 to vector<1x1024xf32>
    %83 = arith.addf %80, %82 : vector<1x1024xf32>
    %84 = math.rsqrt %83 : vector<1x1024xf32>
    %85 = arith.mulf %81, %84 : vector<1x1024xf32>
    %c0_42 = arith.constant 0 : index
    %c0_43 = arith.constant 0 : index
    %86 = vector.load %arg11[%c0_42, %c0_43] : memref<1x1024xf32, #tpu.memory_space<vmem>>, vector<1x1024xf32>
    %87 = arith.mulf %73, %85 : vector<1x1024xf32>
    %88 = arith.subf %86, %87 : vector<1x1024xf32>
    %89 = vector.broadcast %85 : vector<1x1024xf32> to vector<8x1024xf32>
    %90 = arith.mulf %69, %89 : vector<8x1024xf32>
    %91 = vector.broadcast %88 : vector<1x1024xf32> to vector<8x1024xf32>
    %92 = arith.addf %90, %91 : vector<8x1024xf32>
    %cst_44 = arith.constant 2.000000e-01 : f32
    %93 = vector.broadcast %cst_44 : f32 to vector<8x1024xf32>
    %94 = arith.mulf %93, %92 : vector<8x1024xf32>
    %95 = arith.maximumf %92, %94 : vector<8x1024xf32>
    %96 = arith.truncf %95 : vector<8x1024xf32> to vector<8x1024xbf16>
    %c0_45 = arith.constant 0 : index
    %c0_46 = arith.constant 0 : index
    %97 = vector.load %arg12[%c0_45, %c0_46] : memref<1024x256xbf16, #tpu.memory_space<vmem>>, vector<1024x256xbf16>
    %cst_47 = arith.constant dense<0.000000e+00> : vector<8x256xf32>
    %98 = tpu.matmul %96, %97, %cst_47 {dimension_numbers = #tpu.dot_dimension_numbers<[1], [0], [0], [1], [0, 0, 1, 1], [], []>} : vector<8x1024xbf16>, vector<1024x256xbf16>, vector<8x256xf32> -> vector<8x256xf32>
    %c0_48 = arith.constant 0 : index
    %c0_49 = arith.constant 0 : index
    %99 = vector.load %arg13[%c0_48, %c0_49] : memref<1x256xf32, #tpu.memory_space<vmem>>, vector<1x256xf32>
    %100 = vector.broadcast %99 : vector<1x256xf32> to vector<8x256xf32>
    %101 = arith.addf %98, %100 : vector<8x256xf32>
    %102 = math.tanh %101 : vector<8x256xf32>
    %c0_50 = arith.constant 0 : index
    %c0_51 = arith.constant 0 : index
    %103 = vector.load %arg14[%c0_50, %c0_51] : memref<8x256xf32, #tpu.memory_space<vmem>>, vector<8x256xf32>
    tpu.vector_store %arg14[%c0_50, %c0_51], %102 {strides = array<i32>} : memref<8x256xf32, #tpu.memory_space<vmem>>, vector<8x256xf32>,
    return
  }
}

</mosaic_0001>

<bundles_post_ra>
// kernel: generator_forward.1
= control target key start
LH: loop header
LB: loop body
LE: loop exit
PB: predicated region body
PF: predicated region fallthrough
CT: control target
= control target key end

     0   :  { %v5144_v1 = vmov 0.0   ;;  %vm5145_vm0 = vmmov 0   ;;  %vm68_vm1 = vcmask 261120   ;;  %s6940_s0 = inlined_call_operand.vmem [shape: f32[8,32], index: 0, kind: input, shape index: {}]   ;;  %s6941_s1 = inlined_call_operand.vmem [shape: f32[8,128], index: 1, kind: input, shape index: {}]   ;;  %s6942_s2 = inlined_call_operand.vmem [shape: bf16[32,128], index: 2, kind: input, shape index: {}]   ;;  %s6943_s3 = inlined_call_operand.vmem [shape: bf16[128,256], index: 3, kind: input, shape index: {}]   ;;  %s6944_s4 = inlined_call_operand.vmem [shape: f32[1,256], index: 4, kind: input, shape index: {}]   ;;  %s6945_s5 = inlined_call_operand.vmem [shape: f32[1,256], index: 5, kind: input, shape index: {}]   ;;  %s6946_s6 = inlined_call_operand.vmem [shape: bf16[256,512], index: 6, kind: input, shape index: {}]   ;;  %s6947_s7 = inlined_call_operand.vmem [shape: f32[1,512], index: 7, kind: input, shape index: {}]   ;;  %s6948_s8 = inlined_call_operand.vmem [shape: f32[1,512], index: 8, kind: input, shape index: {}]   ;;  %s6949_s9 = inlined_call_operand.vmem [shape: bf16[512,1024], index: 9, kind: input, shape index: {}]   ;;  %s6950_s10 = inlined_call_operand.vmem [shape: f32[1,1024], index: 10, kind: input, shape index: {}]   ;;  %s6951_s11 = inlined_call_operand.vmem [shape: f32[1,1024], index: 11, kind: input, shape index: {}]   ;;  %s6952_s12 = inlined_call_operand.vmem [shape: bf16[1024,256], index: 12, kind: input, shape index: {}]   ;;  %s6953_s13 = inlined_call_operand.vmem [shape: f32[1,256], index: 13, kind: input, shape index: {}]   ;;  %s6954_s14 = inlined_call_operand.hbm [shape: f32[8,256], index: 14, kind: output, shape index: {}]  }
   0x1   :  { %v4774_v0 = vld [vmem:[%s6942_s2] sm:$0xff]   ;;  %4733 = vmatprep.subr.bf16.mxu0 %v5144_v1  ;;  %v4775_v2 = vld [vmem:[%s6942_s2 + $0x8] sm:$0xff]   ;;  %4737 = vmatprep.mubr.msk.bf16.mxu0 %vm5145_vm0, %v5144_v1  ;;  %v4779_v6 = vld [vmem:[%s6943_s3 + $0x14] ss:$8 sps:$4 sm:$0xff]  }
   0x2   :  { %4734 = vmatpush3.bf16.msra.mxu0 %v4774_v0  ;;  %v49_v3 = vld [vmem:[%s6940_s0] sm:$0xff]  ;;  %v4781_v8 = vld [vmem:[%s6943_s3 + $0x10] ss:$8 sps:$4 sm:$0xff]   ;;  %v4785_v11 = vld [vmem:[%s6943_s3 + $0x34] ss:$8 sps:$4 sm:$0xff]  }
   0x3   :  { %4735 = vmatprep.subr.bf16.mxu0 %v5144_v1  ;;  %v4776_v4 = vld [vmem:[%s6943_s3 + $0x4] ss:$8 sps:$4 sm:$0xff]   ;;  %v4778_v5 = vld [vmem:[%s6943_s3] ss:$8 sps:$4 sm:$0xff]   ;;  %v50_v7 = vpack.c.bf16 %v49_v3, %v49_v3  ;;  %v4787_v12 = vld [vmem:[%s6943_s3 + $0x30] ss:$8 sps:$4 sm:$0xff]  }
   0x4   :  { %211 = vmatprep.subr.bf16.mxu1 %v4776_v4  ;;  %v4782_v9 = vld [vmem:[%s6943_s3 + $0x24] ss:$8 sps:$4 sm:$0xff]   ;;  %v4784_v10 = vld [vmem:[%s6943_s3 + $0x20] ss:$8 sps:$4 sm:$0xff]   ;;  %v4791_v15 = vld [vmem:[%s6943_s3 + $0x54] ss:$8 sps:$4 sm:$0xff]  }
   0x5   :  { %212 = vmatpush1.bf16.msra.mxu1 %v4778_v5  ;;  %v4788_v13 = vld [vmem:[%s6943_s3 + $0x44] ss:$8 sps:$4 sm:$0xff]   ;;  %v4790_v14 = vld [vmem:[%s6943_s3 + $0x40] ss:$8 sps:$4 sm:$0xff]   ;;  %v4793_v16 = vld [vmem:[%s6943_s3 + $0x50] ss:$8 sps:$4 sm:$0xff]  }
   0x6   :  { %4736 = vmatpush3.bf16.msra.mxu0 %v4775_v2  ;;  %213 = vmatprep.subr.bf16.mxu1 %v4779_v6 }
   0x9   :  { %4738 = vmatmul.mubr.msk.bf16.vlgmr.msra.gmra.mrb[0].mxu0 %vm68_vm1, %v50_v7  ;;  %214 = vmatpush1.bf16.msra.mxu1 %v4781_v8 }
   0xa   :  { %215 = vmatprep.subr.bf16.mxu1 %v4782_v9 }
   0xd   :  { %216 = vmatpush1.bf16.msra.mxu1 %v4784_v10 }
   0xe   :  { %217 = vmatprep.subr.bf16.mxu1 %v4785_v11 }
  0x11   :  { %218 = vmatpush1.bf16.msra.mxu1 %v4787_v12 }
  0x12   :  { %219 = vmatprep.subr.bf16.mxu1 %v4788_v13 }
  0x15   :  { %220 = vmatpush1.bf16.msra.mxu1 %v4790_v14 }
  0x16   :  { %221 = vmatprep.subr.bf16.mxu1 %v4791_v15 }
  0x19   :  { %222 = vmatpush1.bf16.msra.mxu1 %v4793_v16 }
  0x1a   :  { %19 = vsyncpa [#allocation3], 0  ;;  %v4794_v17 = vld [vmem:[%s6943_s3 + $0x64] ss:$8 sps:$4 sm:$0xff]   ;;  %v4796_v18 = vld [vmem:[%s6943_s3 + $0x60] ss:$8 sps:$4 sm:$0xff]  }
  0x1b   :  { %223 = vmatprep.subr.bf16.mxu1 %v4794_v17  ;;  %v4797_v19 = vld [vmem:[%s6943_s3 + $0x74] ss:$8 sps:$4 sm:$0xff]   ;;  %v4799_v20 = vld [vmem:[%s6943_s3 + $0x70] ss:$8 sps:$4 sm:$0xff]   ;;  %v5146_v21 = vmov 0   ;;  %v55_v23 = vld [vmem:[%s6941_s1] sm:$0xff] }
  0x1c   :  { %243 = vmatprep.mubr.bf16.mxu1 %v5146_v21  ;;  %v4802_v22 = vld [vmem:[%s6946_s6 + $0x4] ss:$16 sps:$4 sm:$0xff]   ;;  %v4800_v31 = vld [vmem:[%s6946_s6] ss:$16 sps:$4 sm:$0xff]   ;;  %v4850_v63 = vld [vmem:[%s6946_s6 + $0xc] ss:$16 sps:$4 sm:$0xff]  }
  0x1d   :  { %224 = vmatpush1.bf16.msra.mxu1 %v4796_v18  ;;  %v4805_v33 = vld [vmem:[%s6946_s6 + $0x24] ss:$16 sps:$4 sm:$0xff]   ;;  %v4803_v34 = vld [vmem:[%s6946_s6 + $0x20] ss:$16 sps:$4 sm:$0xff]  }
  0x1e   :  { %225 = vmatprep.subr.bf16.mxu1 %v4797_v19  ;;  %v4808_v35 = vld [vmem:[%s6946_s6 + $0x44] ss:$16 sps:$4 sm:$0xff]   ;;  %v4806_v36 = vld [vmem:[%s6946_s6 + $0x40] ss:$16 sps:$4 sm:$0xff]  }
  0x1f   :  { %v4811_v37 = vld [vmem:[%s6946_s6 + $0x64] ss:$16 sps:$4 sm:$0xff]   ;;  %v4809_v38 = vld [vmem:[%s6946_s6 + $0x60] ss:$16 sps:$4 sm:$0xff]  }
  0x20   :  { %v4814_v39 = vld [vmem:[%s6946_s6 + $0x84] ss:$16 sps:$4 sm:$0xff]   ;;  %v4812_v40 = vld [vmem:[%s6946_s6 + $0x80] ss:$16 sps:$4 sm:$0xff]  }
  0x21   :  { %226 = vmatpush1.bf16.msra.mxu1 %v4799_v20  ;;  %v4817_v41 = vld [vmem:[%s6946_s6 + $0xa4] ss:$16 sps:$4 sm:$0xff]   ;;  %v4815_v42 = vld [vmem:[%s6946_s6 + $0xa0] ss:$16 sps:$4 sm:$0xff]  }
  0x22   :  { %749 = vmatprep.subr.bf16.mxu1 %v4802_v22  ;;  %v4820_v43 = vld [vmem:[%s6946_s6 + $0xc4] ss:$16 sps:$4 sm:$0xff]   ;;  %v4818_v44 = vld [vmem:[%s6946_s6 + $0xc0] ss:$16 sps:$4 sm:$0xff]  }
  0x23   :  { %v4823_v45 = vld [vmem:[%s6946_s6 + $0xe4] ss:$16 sps:$4 sm:$0xff]   ;;  %v4821_v46 = vld [vmem:[%s6946_s6 + $0xe0] ss:$16 sps:$4 sm:$0xff]  }
  0x24   :  { %v4826_v47 = vld [vmem:[%s6946_s6 + $0x104] ss:$16 sps:$4 sm:$0xff]   ;;  %v4824_v48 = vld [vmem:[%s6946_s6 + $0x100] ss:$16 sps:$4 sm:$0xff]  }
  0x25   :  { %v4829_v49 = vld [vmem:[%s6946_s6 + $0x124] ss:$16 sps:$4 sm:$0xff]   ;;  %v4827_v50 = vld [vmem:[%s6946_s6 + $0x120] ss:$16 sps:$4 sm:$0xff]  }
  0x26   :  { %v4832_v51 = vld [vmem:[%s6946_s6 + $0x144] ss:$16 sps:$4 sm:$0xff]   ;;  %v4830_v52 = vld [vmem:[%s6946_s6 + $0x140] ss:$16 sps:$4 sm:$0xff]  }
  0x27   :  { %v4835_v53 = vld [vmem:[%s6946_s6 + $0x164] ss:$16 sps:$4 sm:$0xff]   ;;  %v4833_v54 = vld [vmem:[%s6946_s6 + $0x160] ss:$16 sps:$4 sm:$0xff]  }
  0x28   :  { %v4838_v55 = vld [vmem:[%s6946_s6 + $0x184] ss:$16 sps:$4 sm:$0xff]   ;;  %v4836_v56 = vld [vmem:[%s6946_s6 + $0x180] ss:$16 sps:$4 sm:$0xff]  }
  0x29   :  { %v4841_v57 = vld [vmem:[%s6946_s6 + $0x1a4] ss:$16 sps:$4 sm:$0xff]   ;;  %v4839_v58 = vld [vmem:[%s6946_s6 + $0x1a0] ss:$16 sps:$4 sm:$0xff]  }
  0x2a   :  { %v4844_v59 = vld [vmem:[%s6946_s6 + $0x1c4] ss:$16 sps:$4 sm:$0xff]   ;;  %v4842_v60 = vld [vmem:[%s6946_s6 + $0x1c0] ss:$16 sps:$4 sm:$0xff]  }
  0x2b   :  { %v4847_v61 = vld [vmem:[%s6946_s6 + $0x1e4] ss:$16 sps:$4 sm:$0xff]   ;;  %v4845_v62 = vld [vmem:[%s6946_s6 + $0x1e0] ss:$16 sps:$4 sm:$0xff]  }
  0xdc   :  { %v106_v24 = vpop.f32.mrb[0].mxu0 }
  0xdd   :  { %v107_v25 = vadd.f32 %v106_v24, %v55_v23  ;;  %v4739_v26 = vpop.f32.mrb[1].mxu0 }
  0xde   :  { %v109_v27 = vpop.f32.mrb[2].mxu0 }
  0xdf   :  { %v112_v28 = vmul.f32 0.2, %v107_v25  ;;  %v4740_v29 = vpop.f32.mrb[3].mxu0 }
  0xe1   :  { %v113_v30 = vmax.f32 %v107_v25, %v112_v28 }
  0xe3   :  { %v114_v32 = vpack.c.bf16 %v113_v30, %v113_v30 }
  0xe5   :  { %244 = vmatmul.mubr.bf16.vlgmr.msra.gmra.mrb[0].mxu1 %v114_v32 }
  0xe6   :  { %750 = vmatpush1.bf16.msra.mxu1 %v4800_v31 }
  0xe7   :  { %751 = vmatprep.subr.bf16.mxu1 %v4805_v33 }
  0xea   :  { %752 = vmatpush1.bf16.msra.mxu1 %v4803_v34 }
  0xeb   :  { %753 = vmatprep.subr.bf16.mxu1 %v4808_v35 }
  0xee   :  { %754 = vmatpush1.bf16.msra.mxu1 %v4806_v36 }
  0xef   :  { %755 = vmatprep.subr.bf16.mxu1 %v4811_v37 }
  0xf2   :  { %756 = vmatpush1.bf16.msra.mxu1 %v4809_v38 }
  0xf3   :  { %757 = vmatprep.subr.bf16.mxu1 %v4814_v39 }
  0xf6   :  { %758 = vmatpush1.bf16.msra.mxu1 %v4812_v40  ;;  %v5147_v40 = vmov 1966171168  }
  0xf7   :  { %759 = vmatprep.subr.bf16.mxu1 %v4817_v41  ;;  %v296_v41 = vunpack.c.l.s4 %v5147_v40  ;;  %v4890_v40 = vld [vmem:[%s6946_s6 + $0x1c8] ss:$16 sps:$4 sm:$0xff]  }
  0xfa   :  { %760 = vmatpush1.bf16.msra.mxu1 %v4815_v42  ;;  %v298_v42 = vlaneseq }
  0xfb   :  { %761 = vmatprep.subr.bf16.mxu1 %v4820_v43  ;;  %v297_v43 = vunpack.c.0.s8 %v296_v41  ;;  %v4895_v41 = vld [vmem:[%s6946_s6 + $0x1ec] ss:$16 sps:$4 sm:$0xff]  }
  0xfe   :  { %762 = vmatpush1.bf16.msra.mxu1 %v4818_v44  ;;  %v5383_v44 = vshrl.u32 %v298_v42, 7  ;;  %v4893_v42 = vld [vmem:[%s6946_s6 + $0x1e8] ss:$16 sps:$4 sm:$0xff]  }
  0xff   :  { %763 = vmatprep.subr.bf16.mxu1 %v4823_v45 }
 0x102   :  { %764 = vmatpush1.bf16.msra.mxu1 %v4821_v46  ;;  %v5386_v46 = vsub.s32 %v297_v43, %v5383_v44  ;;  %v1035_v43 = vld [vmem:[%s6949_s9] sm:$0xff] }
 0x103   :  { %765 = vmatprep.subr.bf16.mxu1 %v4826_v47 }
 0x106   :  { %766 = vmatpush1.bf16.msra.mxu1 %v4824_v48 }
 0x107   :  { %767 = vmatprep.subr.bf16.mxu1 %v4829_v49 }
 0x10a   :  { %768 = vmatpush1.bf16.msra.mxu1 %v4827_v50  ;;  %v287_v50 = vld [vmem:[%s6944_s4] sm:$0x3] }
 0x10b   :  { %769 = vmatprep.subr.bf16.mxu1 %v4832_v51 }
 0x10e   :  { %770 = vmatpush1.bf16.msra.mxu1 %v4830_v52  ;;  %v5394_v52 = vsub.s32 0, %v5383_v44 }
 0x10f   :  { %771 = vmatprep.subr.bf16.mxu1 %v4835_v53  ;;  %v5397_v53 = vsub.s32 1, %v5383_v44 }
 0x112   :  { %772 = vmatpush1.bf16.msra.mxu1 %v4833_v54 }
 0x113   :  { %773 = vmatprep.subr.bf16.mxu1 %v4838_v55 }
 0x116   :  { %774 = vmatpush1.bf16.msra.mxu1 %v4836_v56 }
 0x117   :  { %775 = vmatprep.subr.bf16.mxu1 %v4841_v57 }
 0x11a   :  { %776 = vmatpush1.bf16.msra.mxu1 %v4839_v58 }
 0x11b   :  { %777 = vmatprep.subr.bf16.mxu1 %v4844_v59 }
 0x11e   :  { %778 = vmatpush1.bf16.msra.mxu1 %v4842_v60 }
 0x11f   :  { %779 = vmatprep.subr.bf16.mxu1 %v4847_v61 }
 0x122   :  { %780 = vmatpush1.bf16.msra.mxu1 %v4845_v62 }
 0x123   :  { %790 = vmatprep.subr.bf16.mxu1 %v4850_v63  ;;  %v311_v63 = vld [vmem:[%s6945_s5] sm:$0x3] }
 0x1b8   :  { %v245_v0 = vpop.f32.mrb[0].mxu1 }
 0x1b9   :  { %v252_v1 = vrot.slane %v245_v0, 4  ;;  %v267_v2 = vmul.f32 %v245_v0, %v245_v0  ;;  %v247_v3 = vpop.f32.mrb[1].mxu1 }
 0x1ba   :  { %v258_v4 = vrot.slane %v247_v3, 4  ;;  %v268_v5 = vmul.f32 %v247_v3, %v247_v3  ;;  %v249_v6 = vpop.f32.mrb[2].mxu1 }
 0x1bb   :  { %v253_v7 = vadd.f32 %v252_v1, %v245_v0  ;;  %v269_v8 = vrot.slane %v267_v2, 4  ;;  %v250_v9 = vpop.f32.mrb[3].mxu1 }
 0x1bc   :  { %v259_v10 = vadd.f32 %v258_v4, %v247_v3  ;;  %v275_v11 = vrot.slane %v268_v5, 4 }
 0x1bd   :  { %v254_v12 = vrot.slane %v253_v7, 2  ;;  %v270_v13 = vadd.f32 %v269_v8, %v267_v2 }
 0x1be   :  { %v260_v14 = vrot.slane %v259_v10, 2  ;;  %v276_v15 = vadd.f32 %v275_v11, %v268_v5  ;;  %v4848_v11 = vld [vmem:[%s6946_s6 + $0x8] ss:$16 sps:$4 sm:$0xff]  }
 0x1bf   :  { %v255_v16 = vadd.f32 %v254_v12, %v253_v7  ;;  %v271_v17 = vrot.slane %v270_v13, 2 }
 0x1c0   :  { %v261_v18 = vadd.f32 %v260_v14, %v259_v10  ;;  %v277_v19 = vrot.slane %v276_v15, 2  ;;  %v4851_v14 = vld [vmem:[%s6946_s6 + $0x28] ss:$16 sps:$4 sm:$0xff]  }
 0x1c1   :  { %v256_v20 = vrot.slane %v255_v16, 1  ;;  %v272_v21 = vadd.f32 %v271_v17, %v270_v13  ;;  %v4853_v13 = vld [vmem:[%s6946_s6 + $0x2c] ss:$16 sps:$4 sm:$0xff]  }
 0x1c2   :  { %v262_v22 = vrot.slane %v261_v18, 1  ;;  %v278_v23 = vadd.f32 %v277_v19, %v276_v15  ;;  %v4856_v15 = vld [vmem:[%s6946_s6 + $0x4c] ss:$16 sps:$4 sm:$0xff]  }
 0x1c3   :  { %v257_v24 = vadd.f32 %v256_v20, %v255_v16  ;;  %v273_v25 = vrot.slane %v272_v21, 1  ;;  %v4854_v16 = vld [vmem:[%s6946_s6 + $0x48] ss:$16 sps:$4 sm:$0xff]   ;;  %v4859_v17 = vld [vmem:[%s6946_s6 + $0x6c] ss:$16 sps:$4 sm:$0xff]  }
 0x1c4   :  { %v263_v26 = vadd.f32 %v262_v22, %v261_v18  ;;  %v279_v27 = vrot.slane %v278_v23, 1  ;;  %v4857_v18 = vld [vmem:[%s6946_s6 + $0x68] ss:$16 sps:$4 sm:$0xff]   ;;  %v4862_v19 = vld [vmem:[%s6946_s6 + $0x8c] ss:$16 sps:$4 sm:$0xff]  }
 0x1c5   :  { %v265_v28 = vmul.f32 0.125, %v257_v24  ;;  %v274_v29 = vadd.f32 %v273_v25, %v272_v21  ;;  %v4860_v20 = vld [vmem:[%s6946_s6 + $0x88] ss:$16 sps:$4 sm:$0xff]   ;;  %v4865_v21 = vld [vmem:[%s6946_s6 + $0xac] ss:$16 sps:$4 sm:$0xff]  }
 0x1c6   :  { %v266_v30 = vmul.f32 0.125, %v263_v26  ;;  %v280_v31 = vadd.f32 %v279_v27, %v278_v23  ;;  %v4863_v22 = vld [vmem:[%s6946_s6 + $0xa8] ss:$16 sps:$4 sm:$0xff]   ;;  %v4868_v23 = vld [vmem:[%s6946_s6 + $0xcc] ss:$16 sps:$4 sm:$0xff]  }
 0x1c7   :  { %v281_v32 = vmul.f32 0.125, %v274_v29  ;;  %v283_v33 = vmul.f32 %v265_v28, %v265_v28  ;;  %v4866_v24 = vld [vmem:[%s6946_s6 + $0xc8] ss:$16 sps:$4 sm:$0xff]   ;;  %v4871_v25 = vld [vmem:[%s6946_s6 + $0xec] ss:$16 sps:$4 sm:$0xff]  }
 0x1c8   :  { %v282_v34 = vmul.f32 0.125, %v280_v31  ;;  %v284_v35 = vmul.f32 %v266_v30, %v266_v30  ;;  %v4869_v26 = vld [vmem:[%s6946_s6 + $0xe8] ss:$16 sps:$4 sm:$0xff]   ;;  %v4874_v27 = vld [vmem:[%s6946_s6 + $0x10c] ss:$16 sps:$4 sm:$0xff]  }
 0x1c9   :  { %v285_v36 = vsub.f32 %v281_v32, %v283_v33  ;;  %v4877_v29 = vld [vmem:[%s6946_s6 + $0x12c] ss:$16 sps:$4 sm:$0xff]   ;;  %v4878_v32 = vld [vmem:[%s6946_s6 + $0x148] ss:$16 sps:$4 sm:$0xff]  }
 0x1ca   :  { %v286_v37 = vsub.f32 %v282_v34, %v284_v35  ;;  %v4880_v31 = vld [vmem:[%s6946_s6 + $0x14c] ss:$16 sps:$4 sm:$0xff]   ;;  %v4881_v34 = vld [vmem:[%s6946_s6 + $0x168] ss:$16 sps:$4 sm:$0xff]  }
 0x1cb   :  { %v288_v38 = vadd.f32 0.8, %v285_v36  ;;  %v4883_v33 = vld [vmem:[%s6946_s6 + $0x16c] ss:$16 sps:$4 sm:$0xff]   ;;  %v4884_v36 = vld [vmem:[%s6946_s6 + $0x188] ss:$16 sps:$4 sm:$0xff]  }
 0x1cc   :  { %v289_v39 = vadd.f32 0.8, %v286_v37  ;;  %v4886_v35 = vld [vmem:[%s6946_s6 + $0x18c] ss:$16 sps:$4 sm:$0xff]  }
 0x1cd   :  { %5088 = vrsqrt.f32 %v288_v38  ;;  %v4889_v37 = vld [vmem:[%s6946_s6 + $0x1ac] ss:$16 sps:$4 sm:$0xff]   ;;  %v4887_v38 = vld [vmem:[%s6946_s6 + $0x1a8] ss:$16 sps:$4 sm:$0xff]  }
 0x1ce   :  { %5090 = vrsqrt.f32 %v289_v39  ;;  %v4892_v39 = vld [vmem:[%s6946_s6 + $0x1cc] ss:$16 sps:$4 sm:$0xff]  }
 0x1d7   :  { %v5089_v45 = vpop.eup %5088 }
 0x1d8   :  { %v5091_v47 = vpop.eup %5090 }
 0x1d9   :  { %v294_v48 = vcombine.low %v5089_v45, %v5091_v47  ;;  %v1039_v45 = vld [vmem:[%s6949_s9 + $0x20] sm:$0xff] }
 0x1da   :  { %v1163_v47 = vld [vmem:[%s6949_s9 + $0x400] sm:$0xff] }
 0x1db   :  { %v301_v49 = vrot.slane %v294_v48, %v5386_v46  ;;  %v4347_v48 = vcombine.high %v1035_v43, %v1039_v45 }
 0x1dd   :  { %v308_v51 = vrot.slane %v301_v49, %v5386_v46  ;;  %v1167_v49 = vld [vmem:[%s6949_s9 + $0x420] sm:$0xff] }
 0x1df   :  { %v310_v54 = vmul.f32 %v308_v51, %v287_v50  ;;  %v4346_v50 = vcombine.low %v1035_v43, %v1039_v45  ;;  %v4474_v51 = vcombine.low %v1163_v47, %v1167_v49  ;;  %v1223_v43 = vld [vmem:[%s6949_s9 + $0x5e0] sm:$0xff] }
 0x1e1   :  { %v316_v55 = vrot.slane %v310_v54, %v5394_v52  ;;  %v320_v56 = vrot.slane %v310_v54, %v5397_v53  ;;  %v4475_v54 = vcombine.high %v1163_v47, %v1167_v49  ;;  %v1099_v49 = vld [vmem:[%s6949_s9 + $0x200] sm:$0xff] }
 0x1e3   :  { %v323_v57 = vmul.f32 %v316_v55, %v265_v28  ;;  %v324_v58 = vmul.f32 %v320_v56, %v266_v30  ;;  %v345_v59 = vmul.f32 %v320_v56, %v247_v3  ;;  %v344_v60 = vmul.f32 %v316_v55, %v245_v0  ;;  %v4872_v28 = vld [vmem:[%s6946_s6 + $0x108] ss:$16 sps:$4 sm:$0xff]   ;;  %2612 = vmatprep.subr.bf16.mxu0 %v4475_v54  ;;  %v1043_v55 = vld [vmem:[%s6949_s9 + $0x40] sm:$0xff] }
 0x1e4   :  { %v4875_v30 = vld [vmem:[%s6946_s6 + $0x128] ss:$16 sps:$4 sm:$0xff]   ;;  %v1047_v56 = vld [vmem:[%s6949_s9 + $0x60] sm:$0xff]  ;;  %2613 = vmatpush1.bf16.msra.mxu0 %v4474_v51 }
 0x1e5   :  { %v327_v61 = vcombine.low %v323_v57, %v324_v58  ;;  %v1171_v57 = vld [vmem:[%s6949_s9 + $0x440] sm:$0xff]  ;;  %v4355_v58 = vcombine.high %v1043_v55, %v1047_v56 }
 0x1e6   :  { %v1227_v51 = vld [vmem:[%s6949_s9 + $0x600] sm:$0xff] }
 0x1e7   :  { %v334_v62 = vrot.slane %v327_v61, %v5386_v46 }
 0x1e9   :  { %v341_v1 = vrot.slane %v334_v62, %v5386_v46 }
 0x1eb   :  { %v343_v2 = vsub.f32 %v311_v63, %v341_v1  ;;  %v1051_v63 = vld [vmem:[%s6949_s9 + $0x80] sm:$0xff] }
 0x1ec   :  { %v1055_v1 = vld [vmem:[%s6949_s9 + $0xa0] sm:$0xff] }
 0x1ed   :  { %v354_v4 = vrot.slane %v343_v2, %v5397_v53  ;;  %v350_v5 = vrot.slane %v343_v2, %v5394_v52  ;;  %v1179_v2 = vld [vmem:[%s6949_s9 + $0x480] sm:$0xff] }
 0x1ef   :  { %v358_v6 = vadd.f32 %v354_v4, %v345_v59  ;;  %v357_v7 = vadd.f32 %v350_v5, %v344_v60  ;;  %v1175_v59 = vld [vmem:[%s6949_s9 + $0x460] sm:$0xff]  ;;  %v4354_v60 = vcombine.low %v1043_v55, %v1047_v56  ;;  %v4363_v4 = vcombine.high %v1051_v63, %v1055_v1 }
 0x1f0   :  { %v4482_v61 = vcombine.low %v1171_v57, %v1175_v59  ;;  %v4483_v62 = vcombine.high %v1171_v57, %v1175_v59  ;;  %v1183_v5 = vld [vmem:[%s6949_s9 + $0x4a0] sm:$0xff] }
 0x1f1   :  { %v360_v8 = vmul.f32 0.2, %v358_v6  ;;  %v359_v9 = vmul.f32 0.2, %v357_v7  ;;  %v1231_v55 = vld [vmem:[%s6949_s9 + $0x620] sm:$0xff] }
 0x1f2   :  { %2614 = vmatprep.subr.bf16.mxu0 %v4483_v62  ;;  %v4538_v57 = vcombine.low %v1227_v51, %v1231_v55  ;;  %v1107_v59 = vld [vmem:[%s6949_s9 + $0x240] sm:$0xff] }
 0x1f3   :  { %v362_v3 = vmax.f32 %v358_v6, %v360_v8  ;;  %v361_v0 = vmax.f32 %v357_v7, %v359_v9  ;;  %2615 = vmatpush1.bf16.msra.mxu0 %v4482_v61  ;;  %v4362_v6 = vcombine.low %v1051_v63, %v1055_v1  ;;  %v4490_v7 = vcombine.low %v1179_v2, %v1183_v5  ;;  %v1059_v9 = vld [vmem:[%s6949_s9 + $0xc0] sm:$0xff] }
 0x1f4   :  { %v4491_v8 = vcombine.high %v1179_v2, %v1183_v5  ;;  %v1235_v61 = vld [vmem:[%s6949_s9 + $0x640] sm:$0xff] }
 0x1f5   :  { %v364_v10 = vpack.c.bf16 %v362_v3, %v362_v3  ;;  %v5411_v12 = vpack.c.bf16 %v361_v0, %v361_v0  ;;  %v1063_v3 = vld [vmem:[%s6949_s9 + $0xe0] sm:$0xff] }
 0x1f6   :  { %2616 = vmatprep.subr.bf16.mxu0 %v4491_v8  ;;  %v1187_v0 = vld [vmem:[%s6949_s9 + $0x4c0] sm:$0xff] }
 0x1f7   :  { %781 = vmatprep.mubr.bf16.mxu1 %v364_v10  ;;  %2617 = vmatpush1.bf16.msra.mxu0 %v4490_v7  ;;  %v1239_v63 = vld [vmem:[%s6949_s9 + $0x660] sm:$0xff] }
 0x1f8   :  { %782 = vmatmul.mubr.bf16.vlgmr.msra.gmra.mrb[4].mxu1 %v5411_v12  ;;  %v4546_v2 = vcombine.low %v1235_v61, %v1239_v63  ;;  %v1115_v5 = vld [vmem:[%s6949_s9 + $0x280] sm:$0xff] }
 0x1f9   :  { %791 = vmatpush1.bf16.msra.mxu1 %v4848_v11  ;;  %822 = vmatprep.mubr.bf16.mxu1 %v364_v10  ;;  %v4371_v10 = vcombine.high %v1059_v9, %v1063_v3  ;;  %v1191_v11 = vld [vmem:[%s6949_s9 + $0x4e0] sm:$0xff] }
 0x1fa   :  { %792 = vmatprep.subr.bf16.mxu1 %v4853_v13  ;;  %v4498_v13 = vcombine.low %v1187_v0, %v1191_v11  ;;  %v1243_v8 = vld [vmem:[%s6949_s9 + $0x680] sm:$0xff] }
 0x1fd   :  { %793 = vmatpush1.bf16.msra.mxu1 %v4851_v14  ;;  %v4499_v14 = vcombine.high %v1187_v0, %v1191_v11  ;;  %v1123_v11 = vld [vmem:[%s6949_s9 + $0x2c0] sm:$0xff] }
 0x1fe   :  { %794 = vmatprep.subr.bf16.mxu1 %v4856_v15  ;;  %v1067_v15 = vld [vmem:[%s6949_s9 + $0x100] sm:$0xff] }
 0x1ff   :  { %2618 = vmatprep.subr.bf16.mxu0 %v4499_v14 }
 0x200   :  { %2619 = vmatpush1.bf16.msra.mxu0 %v4498_v13  ;;  %v1251_v13 = vld [vmem:[%s6949_s9 + $0x6c0] sm:$0xff] }
 0x201   :  { %795 = vmatpush1.bf16.msra.mxu1 %v4854_v16  ;;  %v1071_v16 = vld [vmem:[%s6949_s9 + $0x120] sm:$0xff] }
 0x202   :  { %796 = vmatprep.subr.bf16.mxu1 %v4859_v17  ;;  %v1195_v17 = vld [vmem:[%s6949_s9 + $0x500] sm:$0xff] }
 0x205   :  { %797 = vmatpush1.bf16.msra.mxu1 %v4857_v18  ;;  %v4379_v18 = vcombine.high %v1067_v15, %v1071_v16 }
 0x206   :  { %798 = vmatprep.subr.bf16.mxu1 %v4862_v19  ;;  %v1199_v19 = vld [vmem:[%s6949_s9 + $0x520] sm:$0xff] }
 0x209   :  { %799 = vmatpush1.bf16.msra.mxu1 %v4860_v20  ;;  %v4378_v20 = vcombine.low %v1067_v15, %v1071_v16  ;;  %v1255_v15 = vld [vmem:[%s6949_s9 + $0x6e0] sm:$0xff] }
 0x20a   :  { %800 = vmatprep.subr.bf16.mxu1 %v4865_v21  ;;  %v4506_v21 = vcombine.low %v1195_v17, %v1199_v19 }
 0x20d   :  { %801 = vmatpush1.bf16.msra.mxu1 %v4863_v22  ;;  %v4507_v22 = vcombine.high %v1195_v17, %v1199_v19  ;;  %v4562_v17 = vcombine.low %v1251_v13, %v1255_v15  ;;  %v1131_v19 = vld [vmem:[%s6949_s9 + $0x300] sm:$0xff] }
 0x20e   :  { %802 = vmatprep.subr.bf16.mxu1 %v4868_v23  ;;  %v1075_v23 = vld [vmem:[%s6949_s9 + $0x140] sm:$0xff] }
 0x20f   :  { %2620 = vmatprep.subr.bf16.mxu0 %v4507_v22 }
 0x210   :  { %2621 = vmatpush1.bf16.msra.mxu0 %v4506_v21  ;;  %v1259_v21 = vld [vmem:[%s6949_s9 + $0x700] sm:$0xff] }
 0x211   :  { %803 = vmatpush1.bf16.msra.mxu1 %v4866_v24  ;;  %v1079_v24 = vld [vmem:[%s6949_s9 + $0x160] sm:$0xff] }
 0x212   :  { %804 = vmatprep.subr.bf16.mxu1 %v4871_v25  ;;  %v4387_v25 = vcombine.high %v1075_v23, %v1079_v24 }
 0x215   :  { %805 = vmatpush1.bf16.msra.mxu1 %v4869_v26  ;;  %v1203_v26 = vld [vmem:[%s6949_s9 + $0x540] sm:$0xff] }
 0x216   :  { %806 = vmatprep.subr.bf16.mxu1 %v4874_v27  ;;  %v1207_v27 = vld [vmem:[%s6949_s9 + $0x560] sm:$0xff] }
 0x219   :  { %807 = vmatpush1.bf16.msra.mxu1 %v4872_v28  ;;  %v4386_v28 = vcombine.low %v1075_v23, %v1079_v24  ;;  %v1263_v23 = vld [vmem:[%s6949_s9 + $0x720] sm:$0xff] }
 0x21a   :  { %808 = vmatprep.subr.bf16.mxu1 %v4877_v29  ;;  %v4514_v29 = vcombine.low %v1203_v26, %v1207_v27 }
 0x21d   :  { %809 = vmatpush1.bf16.msra.mxu1 %v4875_v30  ;;  %v4515_v30 = vcombine.high %v1203_v26, %v1207_v27  ;;  %v4571_v26 = vcombine.high %v1259_v21, %v1263_v23  ;;  %v1139_v27 = vld [vmem:[%s6949_s9 + $0x340] sm:$0xff] }
 0x21e   :  { %810 = vmatprep.subr.bf16.mxu1 %v4880_v31  ;;  %v1083_v31 = vld [vmem:[%s6949_s9 + $0x180] sm:$0xff] }
 0x21f   :  { %2622 = vmatprep.subr.bf16.mxu0 %v4515_v30 }
 0x220   :  { %2623 = vmatpush1.bf16.msra.mxu0 %v4514_v29  ;;  %v1267_v29 = vld [vmem:[%s6949_s9 + $0x740] sm:$0xff] }
 0x221   :  { %811 = vmatpush1.bf16.msra.mxu1 %v4878_v32  ;;  %v1087_v32 = vld [vmem:[%s6949_s9 + $0x1a0] sm:$0xff] }
 0x222   :  { %812 = vmatprep.subr.bf16.mxu1 %v4883_v33  ;;  %v1211_v33 = vld [vmem:[%s6949_s9 + $0x580] sm:$0xff] }
 0x225   :  { %813 = vmatpush1.bf16.msra.mxu1 %v4881_v34  ;;  %v4395_v34 = vcombine.high %v1083_v31, %v1087_v32 }
 0x226   :  { %814 = vmatprep.subr.bf16.mxu1 %v4886_v35  ;;  %v1215_v35 = vld [vmem:[%s6949_s9 + $0x5a0] sm:$0xff] }
 0x229   :  { %815 = vmatpush1.bf16.msra.mxu1 %v4884_v36  ;;  %v4394_v36 = vcombine.low %v1083_v31, %v1087_v32  ;;  %v1271_v31 = vld [vmem:[%s6949_s9 + $0x760] sm:$0xff] }
 0x22a   :  { %816 = vmatprep.subr.bf16.mxu1 %v4889_v37  ;;  %v4522_v37 = vcombine.low %v1211_v33, %v1215_v35 }
 0x22d   :  { %817 = vmatpush1.bf16.msra.mxu1 %v4887_v38  ;;  %v4523_v38 = vcombine.high %v1211_v33, %v1215_v35  ;;  %v4578_v33 = vcombine.low %v1267_v29, %v1271_v31  ;;  %v1147_v35 = vld [vmem:[%s6949_s9 + $0x380] sm:$0xff] }
 0x22e   :  { %818 = vmatprep.subr.bf16.mxu1 %v4892_v39  ;;  %v1091_v39 = vld [vmem:[%s6949_s9 + $0x1c0] sm:$0xff] }
 0x22f   :  { %2624 = vmatprep.subr.bf16.mxu0 %v4523_v38 }
 0x230   :  { %2625 = vmatpush1.bf16.msra.mxu0 %v4522_v37  ;;  %v1275_v37 = vld [vmem:[%s6949_s9 + $0x780] sm:$0xff] }
 0x231   :  { %819 = vmatpush1.bf16.msra.mxu1 %v4890_v40  ;;  %v1095_v40 = vld [vmem:[%s6949_s9 + $0x1e0] sm:$0xff] }
 0x232   :  { %820 = vmatprep.subr.bf16.mxu1 %v4895_v41  ;;  %v1219_v41 = vld [vmem:[%s6949_s9 + $0x5c0] sm:$0xff]  ;;  %v4402_v45 = vcombine.low %v1091_v39, %v1095_v40 }
 0x233   :  { %v4530_v47 = vcombine.low %v1219_v41, %v1223_v43 }
 0x235   :  { %821 = vmatpush1.bf16.msra.mxu1 %v4893_v42  ;;  %v4403_v42 = vcombine.high %v1091_v39, %v1095_v40  ;;  %v1279_v39 = vld [vmem:[%s6949_s9 + $0x7a0] sm:$0xff] }
 0x236   :  { %2571 = vmatprep.subr.bf16.mxu1 %v4347_v48  ;;  %v4531_v48 = vcombine.high %v1219_v41, %v1223_v43  ;;  %v4586_v41 = vcombine.low %v1275_v37, %v1279_v39  ;;  %v1155_v43 = vld [vmem:[%s6949_s9 + $0x3c0] sm:$0xff] }
 0x238   :  { %823 = vmatmul.mubr.bf16.vlgmr.msra.gmra.mrb[8].mxu1 %v5411_v12  ;;  %v4370_v12 = vcombine.low %v1059_v9, %v1063_v3  ;;  %2626 = vmatprep.subr.bf16.mxu0 %v4531_v48  ;;  %v1247_v9 = vld [vmem:[%s6949_s9 + $0x6a0] sm:$0xff] }
 0x239   :  { %2572 = vmatpush1.bf16.msra.mxu1 %v4346_v50  ;;  %v1103_v50 = vld [vmem:[%s6949_s9 + $0x220] sm:$0xff]  ;;  %2627 = vmatpush1.bf16.msra.mxu0 %v4530_v47  ;;  %v4554_v0 = vcombine.low %v1243_v8, %v1247_v9 }
 0x23a   :  { %2573 = vmatprep.subr.bf16.mxu1 %v4355_v58  ;;  %v4411_v54 = vcombine.high %v1099_v49, %v1103_v50  ;;  %v4410_v56 = vcombine.low %v1099_v49, %v1103_v50  ;;  %v4539_v58 = vcombine.high %v1227_v51, %v1231_v55  ;;  %v1283_v47 = vld [vmem:[%s6949_s9 + $0x7c0] sm:$0xff] }
 0x23b   :  { %v1287_v50 = vld [vmem:[%s6949_s9 + $0x7e0] sm:$0xff] }
 0x23c   :  { %2628 = vmatprep.subr.bf16.mxu0 %v4539_v58  ;;  %v4594_v51 = vcombine.low %v1283_v47, %v1287_v50 }
 0x23d   :  { %2574 = vmatpush1.bf16.msra.mxu1 %v4354_v60  ;;  %v1111_v60 = vld [vmem:[%s6949_s9 + $0x260] sm:$0xff]  ;;  %2629 = vmatpush1.bf16.msra.mxu0 %v4538_v57 }
 0x23e   :  { %2575 = vmatprep.subr.bf16.mxu1 %v4363_v4  ;;  %v4419_v62 = vcombine.high %v1107_v59, %v1111_v60  ;;  %v4418_v1 = vcombine.low %v1107_v59, %v1111_v60  ;;  %v4547_v4 = vcombine.high %v1235_v61, %v1239_v63  ;;  %v5707_v59 = vld [vmem:[%s6949_s9 + $0x8] sm:$0xff]  ;;  %v5717_v61 = vld [vmem:[%s6949_s9 + $0x10] sm:$0xff] }
 0x23f   :  { %v5712_v60 = vld [vmem:[%s6949_s9 + $0x28] sm:$0xff] }
 0x240   :  { %2630 = vmatprep.subr.bf16.mxu0 %v4547_v4  ;;  %v5727_v4 = vld [vmem:[%s6949_s9 + $0x30] sm:$0xff] }
 0x241   :  { %2576 = vmatpush1.bf16.msra.mxu1 %v4362_v6  ;;  %v1119_v6 = vld [vmem:[%s6949_s9 + $0x2a0] sm:$0xff]  ;;  %2631 = vmatpush1.bf16.msra.mxu0 %v4546_v2  ;;  %v4349_v2 = vcombine.high %v5707_v59, %v5712_v60 }
 0x242   :  { %2577 = vmatprep.subr.bf16.mxu1 %v4371_v10  ;;  %v4427_v7 = vcombine.high %v1115_v5, %v1119_v6  ;;  %v4426_v3 = vcombine.low %v1115_v5, %v1119_v6  ;;  %v4555_v10 = vcombine.high %v1243_v8, %v1247_v9  ;;  %v4348_v8 = vcombine.low %v5707_v59, %v5712_v60  ;;  %v1064_v59 = vld [vmem:[%s6949_s9 + $0xe8] sm:$0xff]  ;;  %v1061_v60 = vld [vmem:[%s6949_s9 + $0xd0] sm:$0xff] }
 0x243   :  { %v4350_v9 = vcombine.low %v5717_v61, %v5727_v4 }
 0x244   :  { %2632 = vmatprep.subr.bf16.mxu0 %v4555_v10  ;;  %v4351_v10 = vcombine.high %v5717_v61, %v5727_v4  ;;  %v1065_v61 = vld [vmem:[%s6949_s9 + $0xf0] sm:$0xff] }
 0x245   :  { %2578 = vmatpush1.bf16.msra.mxu1 %v4370_v12  ;;  %v1127_v12 = vld [vmem:[%s6949_s9 + $0x2e0] sm:$0xff]  ;;  %2633 = vmatpush1.bf16.msra.mxu0 %v4554_v0 }
 0x246   :  { %2579 = vmatprep.subr.bf16.mxu1 %v4379_v18  ;;  %v4435_v14 = vcombine.high %v1123_v11, %v1127_v12  ;;  %v4434_v16 = vcombine.low %v1123_v11, %v1127_v12  ;;  %v4563_v18 = vcombine.high %v1251_v13, %v1255_v15 }
 0x248   :  { %2634 = vmatprep.subr.bf16.mxu0 %v4563_v18 }
 0x249   :  { %2580 = vmatpush1.bf16.msra.mxu1 %v4378_v20  ;;  %v1135_v20 = vld [vmem:[%s6949_s9 + $0x320] sm:$0xff]  ;;  %2635 = vmatpush1.bf16.msra.mxu0 %v4562_v17 }
 0x24a   :  { %2581 = vmatprep.subr.bf16.mxu1 %v4387_v25  ;;  %v4443_v22 = vcombine.high %v1131_v19, %v1135_v20  ;;  %v4442_v24 = vcombine.low %v1131_v19, %v1135_v20  ;;  %v4570_v25 = vcombine.low %v1259_v21, %v1263_v23  ;;  %2636 = vmatprep.subr.bf16.mxu0 %v4571_v26 }
 0x24d   :  { %2582 = vmatpush1.bf16.msra.mxu1 %v4386_v28  ;;  %v1143_v28 = vld [vmem:[%s6949_s9 + $0x360] sm:$0xff]  ;;  %2637 = vmatpush1.bf16.msra.mxu0 %v4570_v25 }
 0x24e   :  { %2583 = vmatprep.subr.bf16.mxu1 %v4395_v34  ;;  %v4451_v30 = vcombine.high %v1139_v27, %v1143_v28  ;;  %v4450_v32 = vcombine.low %v1139_v27, %v1143_v28  ;;  %v4579_v34 = vcombine.high %v1267_v29, %v1271_v31 }
 0x250   :  { %2638 = vmatprep.subr.bf16.mxu0 %v4579_v34 }
 0x251   :  { %2584 = vmatpush1.bf16.msra.mxu1 %v4394_v36  ;;  %v1151_v36 = vld [vmem:[%s6949_s9 + $0x3a0] sm:$0xff]  ;;  %2639 = vmatpush1.bf16.msra.mxu0 %v4578_v33 }
 0x252   :  { %2585 = vmatprep.subr.bf16.mxu1 %v4403_v42  ;;  %v4459_v38 = vcombine.high %v1147_v35, %v1151_v36  ;;  %v4458_v40 = vcombine.low %v1147_v35, %v1151_v36  ;;  %v4587_v42 = vcombine.high %v1275_v37, %v1279_v39 }
 0x254   :  { %2640 = vmatprep.subr.bf16.mxu0 %v4587_v42 }
 0x255   :  { %2586 = vmatpush1.bf16.msra.mxu1 %v4402_v45  ;;  %v1159_v45 = vld [vmem:[%s6949_s9 + $0x3e0] sm:$0xff]  ;;  %2641 = vmatpush1.bf16.msra.mxu0 %v4586_v41 }
 0x256   :  { %2587 = vmatprep.subr.bf16.mxu1 %v4411_v54  ;;  %v4466_v48 = vcombine.low %v1155_v43, %v1159_v45  ;;  %v4467_v49 = vcombine.high %v1155_v43, %v1159_v45  ;;  %v4595_v54 = vcombine.high %v1283_v47, %v1287_v50 }
 0x258   :  { %2642 = vmatprep.subr.bf16.mxu0 %v4595_v54 }
 0x259   :  { %2588 = vmatpush1.bf16.msra.mxu1 %v4410_v56  ;;  %2643 = vmatpush1.bf16.msra.mxu0 %v4594_v51 }
 0x25a   :  { %2589 = vmatprep.subr.bf16.mxu1 %v4419_v62  ;;  %2735 = vmatprep.subr.bf16.mxu0 %v4351_v10 }
 0x25d   :  { %2590 = vmatpush1.bf16.msra.mxu1 %v4418_v1 }
 0x25e   :  { %2591 = vmatprep.subr.bf16.mxu1 %v4427_v7 }
 0x261   :  { %2592 = vmatpush1.bf16.msra.mxu1 %v4426_v3 }
 0x262   :  { %2593 = vmatprep.subr.bf16.mxu1 %v4435_v14 }
 0x265   :  { %2594 = vmatpush1.bf16.msra.mxu1 %v4434_v16 }
 0x266   :  { %2595 = vmatprep.subr.bf16.mxu1 %v4443_v22 }
 0x269   :  { %2596 = vmatpush1.bf16.msra.mxu1 %v4442_v24 }
 0x26a   :  { %2597 = vmatprep.subr.bf16.mxu1 %v4451_v30 }
 0x26d   :  { %2598 = vmatpush1.bf16.msra.mxu1 %v4450_v32 }
 0x26e   :  { %2599 = vmatprep.subr.bf16.mxu1 %v4459_v38 }
 0x271   :  { %2600 = vmatpush1.bf16.msra.mxu1 %v4458_v40 }
 0x272   :  { %2601 = vmatprep.subr.bf16.mxu1 %v4467_v49 }
 0x275   :  { %2602 = vmatpush1.bf16.msra.mxu1 %v4466_v48 }
 0x276   :  { %2653 = vmatprep.subr.bf16.mxu1 %v4349_v2 }
 0x2cb   :  { %v5697_v55 = vpop.f32.mrb[4].mxu1 }
 0x2cc   :  { %v831_v56 = vrot.slane %v5697_v55, 4  ;;  %v859_v57 = vmul.f32 %v5697_v55, %v5697_v55  ;;  %v5702_v58 = vpop.f32.mrb[5].mxu1 }
 0x2cd   :  { %v837_v62 = vrot.slane %v5702_v58, 4  ;;  %v860_v63 = vmul.f32 %v5702_v58, %v5702_v58  ;;  %v787_v1 = vpop.f32.mrb[6].mxu1 }
 0x2ce   :  { %v832_v5 = vadd.f32 %v831_v56, %v5697_v55  ;;  %v863_v6 = vrot.slane %v859_v57, 4  ;;  %v788_v7 = vpop.f32.mrb[7].mxu1 }
 0x2cf   :  { %v838_v3 = vadd.f32 %v837_v62, %v5702_v58  ;;  %v869_v0 = vrot.slane %v860_v63, 4 }
 0x2d0   :  { %v833_v11 = vrot.slane %v832_v5, 2  ;;  %v864_v12 = vadd.f32 %v863_v6, %v859_v57 }
 0x2d1   :  { %v839_v13 = vrot.slane %v838_v3, 2  ;;  %v870_v14 = vadd.f32 %v869_v0, %v860_v63 }
 0x2d2   :  { %v834_v15 = vadd.f32 %v833_v11, %v832_v5  ;;  %v865_v16 = vrot.slane %v864_v12, 2 }
 0x2d3   :  { %v840_v17 = vadd.f32 %v839_v13, %v838_v3  ;;  %v871_v18 = vrot.slane %v870_v14, 2 }
 0x2d4   :  { %v835_v19 = vrot.slane %v834_v15, 1  ;;  %v866_v20 = vadd.f32 %v865_v16, %v864_v12 }
 0x2d5   :  { %v841_v21 = vrot.slane %v840_v17, 1  ;;  %v872_v22 = vadd.f32 %v871_v18, %v870_v14 }
 0x2d6   :  { %v836_v23 = vadd.f32 %v835_v19, %v834_v15  ;;  %v867_v24 = vrot.slane %v866_v20, 1 }
 0x2d7   :  { %v842_v25 = vadd.f32 %v841_v21, %v840_v17  ;;  %v873_v26 = vrot.slane %v872_v22, 1 }
 0x2d8   :  { %v5737_v27 = vmul.f32 0.125, %v836_v23  ;;  %v868_v28 = vadd.f32 %v867_v24, %v866_v20 }
 0x2d9   :  { %v5739_v29 = vmul.f32 0.125, %v842_v25  ;;  %v874_v30 = vadd.f32 %v873_v26, %v872_v22 }
 0x2da   :  { %v887_v31 = vmul.f32 0.125, %v868_v28  ;;  %v891_v32 = vmul.f32 %v5737_v27, %v5737_v27 }
 0x2db   :  { %v888_v33 = vmul.f32 0.125, %v874_v30  ;;  %v892_v34 = vmul.f32 %v5739_v29, %v5739_v29 }
 0x2dc   :  { %v895_v35 = vsub.f32 %v887_v31, %v891_v32 }
 0x2dd   :  { %v896_v36 = vsub.f32 %v888_v33, %v892_v34 }
 0x2de   :  { %v900_v37 = vadd.f32 0.8, %v895_v35 }
 0x2df   :  { %v901_v38 = vadd.f32 0.8, %v896_v36 }
 0x2e0   :  { %5092 = vrsqrt.f32 %v900_v37 }
 0x2e1   :  { %5094 = vrsqrt.f32 %v901_v38  ;;  %v899_v38 = vld [vmem:[%s6947_s7] sm:$0xf] }
 0x2ea   :  { %v5093_v39 = vpop.eup %5092 }
 0x2eb   :  { %v5095_v40 = vpop.eup %5094 }
 0x2ec   :  { %v912_v41 = vcombine.low %v5093_v39, %v5095_v40  ;;  %v5758_v40 = vsub.s32 2, %v5383_v44 }
 0x2ee   :  { %v920_v35 = vrot.slane %v912_v41, %v5386_v46 }
 0x30b   :  { %v5745_v42 = vpop.f32.mrb[8].mxu1 }
 0x30c   :  { %v843_v43 = vrot.slane %v5745_v42, 4  ;;  %v861_v45 = vmul.f32 %v5745_v42, %v5745_v42  ;;  %v826_v47 = vpop.f32.mrb[9].mxu1 }
 0x30d   :  { %v849_v48 = vrot.slane %v826_v47, 4  ;;  %v862_v49 = vmul.f32 %v826_v47, %v826_v47  ;;  %v828_v50 = vpop.f32.mrb[10].mxu1 }
 0x30e   :  { %v844_v51 = vadd.f32 %v843_v43, %v5745_v42  ;;  %v875_v54 = vrot.slane %v861_v45, 4  ;;  %v829_v56 = vpop.f32.mrb[11].mxu1  ;;  %v5761_v43 = vsub.s32 3, %v5383_v44 }
 0x30f   :  { %v850_v57 = vadd.f32 %v849_v48, %v826_v47  ;;  %v881_v62 = vrot.slane %v862_v49, 4 }
 0x310   :  { %v845_v63 = vrot.slane %v844_v51, 2  ;;  %v876_v1 = vadd.f32 %v875_v54, %v861_v45 }
 0x311   :  { %v851_v2 = vrot.slane %v850_v57, 2  ;;  %v882_v5 = vadd.f32 %v881_v62, %v862_v49 }
 0x312   :  { %v846_v6 = vadd.f32 %v845_v63, %v844_v51  ;;  %v877_v7 = vrot.slane %v876_v1, 2 }
 0x313   :  { %v852_v3 = vadd.f32 %v851_v2, %v850_v57  ;;  %v883_v0 = vrot.slane %v882_v5, 2 }
 0x314   :  { %v847_v10 = vrot.slane %v846_v6, 1  ;;  %v878_v11 = vadd.f32 %v877_v7, %v876_v1 }
 0x315   :  { %v853_v12 = vrot.slane %v852_v3, 1  ;;  %v884_v13 = vadd.f32 %v883_v0, %v882_v5 }
 0x316   :  { %v848_v14 = vadd.f32 %v847_v10, %v846_v6  ;;  %v879_v15 = vrot.slane %v878_v11, 1 }
 0x317   :  { %v854_v16 = vadd.f32 %v853_v12, %v852_v3  ;;  %v885_v17 = vrot.slane %v884_v13, 1 }
 0x318   :  { %v857_v18 = vmul.f32 0.125, %v848_v14  ;;  %v880_v19 = vadd.f32 %v879_v15, %v878_v11 }
 0x319   :  { %v858_v20 = vmul.f32 0.125, %v854_v16  ;;  %v886_v21 = vadd.f32 %v885_v17, %v884_v13 }
 0x31a   :  { %v889_v22 = vmul.f32 0.125, %v880_v19  ;;  %v893_v23 = vmul.f32 %v857_v18, %v857_v18 }
 0x31b   :  { %v890_v24 = vmul.f32 0.125, %v886_v21  ;;  %v894_v25 = vmul.f32 %v858_v20, %v858_v20 }
 0x31c   :  { %v897_v26 = vsub.f32 %v889_v22, %v893_v23  ;;  %v1044_v22 = vld [vmem:[%s6949_s9 + $0x48] sm:$0xff] }
 0x31d   :  { %v898_v28 = vsub.f32 %v890_v24, %v894_v25  ;;  %v1048_v24 = vld [vmem:[%s6949_s9 + $0x68] sm:$0xff]  ;;  %v1045_v25 = vld [vmem:[%s6949_s9 + $0x50] sm:$0xff] }
 0x31e   :  { %v902_v30 = vadd.f32 0.8, %v897_v26  ;;  %v1049_v26 = vld [vmem:[%s6949_s9 + $0x70] sm:$0xff] }
 0x31f   :  { %v903_v31 = vadd.f32 0.8, %v898_v28 }
 0x320   :  { %5096 = vrsqrt.f32 %v902_v30 }
 0x321   :  { %5098 = vrsqrt.f32 %v903_v31 }
 0x32a   :  { %v5097_v32 = vpop.eup %5096 }
 0x32b   :  { %v5099_v33 = vpop.eup %5098 }
 0x32c   :  { %v913_v34 = vcombine.low %v5097_v32, %v5099_v33  ;;  %v1052_v33 = vld [vmem:[%s6949_s9 + $0x88] sm:$0xff] }
 0x32e   :  { %v927_v36 = vrot.slane %v913_v34, %v5386_v46  ;;  %v4357_v34 = vcombine.high %v1044_v22, %v1048_v24 }
 0x330   :  { %v928_v37 = vcombine.low %v920_v35, %v927_v36  ;;  %v4359_v35 = vcombine.high %v1045_v25, %v1049_v26  ;;  %v1056_v36 = vld [vmem:[%s6949_s9 + $0xa8] sm:$0xff] }
 0x331   :  { %v4364_v4 = vcombine.low %v1052_v33, %v1056_v36 }
 0x332   :  { %v935_v39 = vrot.slane %v928_v37, %v5386_v46  ;;  %v1053_v37 = vld [vmem:[%s6949_s9 + $0x90] sm:$0xff] }
 0x334   :  { %v937_v45 = vmul.f32 %v935_v39, %v899_v38  ;;  %v1057_v38 = vld [vmem:[%s6949_s9 + $0xb0] sm:$0xff]  ;;  %v4356_v39 = vcombine.low %v1044_v22, %v1048_v24  ;;  %v1104_v24 = vld [vmem:[%s6949_s9 + $0x228] sm:$0xff] }
 0x336   :  { %v943_v48 = vrot.slane %v937_v45, %v5394_v52  ;;  %v947_v41 = vrot.slane %v937_v45, %v5397_v53  ;;  %v951_v49 = vrot.slane %v937_v45, %v5758_v40  ;;  %v955_v50 = vrot.slane %v937_v45, %v5761_v43 }
 0x337   :  { %v4358_v45 = vcombine.low %v1045_v25, %v1049_v26  ;;  %v1101_v25 = vld [vmem:[%s6949_s9 + $0x210] sm:$0xff] }
 0x338   :  { %v960_v51 = vmul.f32 %v943_v48, %v5737_v27  ;;  %v961_v54 = vmul.f32 %v947_v41, %v5739_v29  ;;  %v962_v56 = vmul.f32 %v951_v49, %v857_v18  ;;  %v963_v57 = vmul.f32 %v955_v50, %v858_v20  ;;  %v938_v27 = vld [vmem:[%s6948_s8] sm:$0xf]  ;;  %v1105_v26 = vld [vmem:[%s6949_s9 + $0x230] sm:$0xff] }
 0x339   :  { %v997_v62 = vmul.f32 %v955_v50, %v826_v47  ;;  %v995_v63 = vmul.f32 %v947_v41, %v5702_v58  ;;  %v994_v1 = vmul.f32 %v943_v48, %v5697_v55  ;;  %v996_v2 = vmul.f32 %v951_v49, %v5745_v42  ;;  %v1060_v49 = vld [vmem:[%s6949_s9 + $0xc8] sm:$0xff] }
 0x33a   :  { %v968_v5 = vcombine.low %v960_v51, %v961_v54  ;;  %v969_v6 = vcombine.low %v962_v56, %v963_v57  ;;  %v4365_v48 = vcombine.high %v1052_v33, %v1056_v36  ;;  %v4367_v41 = vcombine.high %v1053_v37, %v1057_v38  ;;  %v1068_v51 = vld [vmem:[%s6949_s9 + $0x108] sm:$0xff]  ;;  %v1069_v56 = vld [vmem:[%s6949_s9 + $0x110] sm:$0xff] }
 0x33b   :  { %v4375_v50 = vcombine.high %v1061_v60, %v1065_v61  ;;  %v1072_v54 = vld [vmem:[%s6949_s9 + $0x128] sm:$0xff]  ;;  %v1073_v57 = vld [vmem:[%s6949_s9 + $0x130] sm:$0xff]  ;;  %v4415_v36 = vcombine.high %v1101_v25, %v1105_v26 }
 0x33c   :  { %v976_v7 = vrot.slane %v968_v5, %v5386_v46  ;;  %v983_v3 = vrot.slane %v969_v6, %v5386_v46  ;;  %v1076_v5 = vld [vmem:[%s6949_s9 + $0x148] sm:$0xff] }
 0x33d   :  { %v1080_v6 = vld [vmem:[%s6949_s9 + $0x168] sm:$0xff] }
 0x33e   :  { %v984_v0 = vcombine.low %v976_v7, %v983_v3  ;;  %v1077_v7 = vld [vmem:[%s6949_s9 + $0x150] sm:$0xff] }
 0x33f   :  { %v1081_v3 = vld [vmem:[%s6949_s9 + $0x170] sm:$0xff] }
 0x340   :  { %v991_v29 = vrot.slane %v984_v0, %v5386_v46  ;;  %v4380_v0 = vcombine.low %v1068_v51, %v1072_v54 }
 0x342   :  { %v993_v47 = vsub.f32 %v938_v27, %v991_v29  ;;  %v4382_v27 = vcombine.low %v1069_v56, %v1073_v57  ;;  %v4389_v29 = vcombine.high %v1076_v5, %v1080_v6 }
 0x344   :  { %v1014_v58 = vrot.slane %v993_v47, %v5761_v43  ;;  %v1006_v55 = vrot.slane %v993_v47, %v5397_v53  ;;  %v1002_v42 = vrot.slane %v993_v47, %v5394_v52  ;;  %v1010_v10 = vrot.slane %v993_v47, %v5758_v40 }
 0x345   :  { %v4391_v47 = vcombine.high %v1077_v7, %v1081_v3 }
 0x346   :  { %v1022_v11 = vadd.f32 %v1014_v58, %v997_v62  ;;  %v1020_v12 = vadd.f32 %v1006_v55, %v995_v63  ;;  %v1019_v13 = vadd.f32 %v1002_v42, %v994_v1  ;;  %v1021_v14 = vadd.f32 %v1010_v10, %v996_v2  ;;  %v1084_v58 = vld [vmem:[%s6949_s9 + $0x188] sm:$0xff]  ;;  %v1085_v42 = vld [vmem:[%s6949_s9 + $0x190] sm:$0xff] }
 0x347   :  { %v4372_v62 = vcombine.low %v1060_v49, %v1064_v59  ;;  %v4374_v63 = vcombine.low %v1061_v60, %v1065_v61  ;;  %v4381_v1 = vcombine.high %v1068_v51, %v1072_v54  ;;  %v4383_v2 = vcombine.high %v1069_v56, %v1073_v57  ;;  %v1088_v55 = vld [vmem:[%s6949_s9 + $0x1a8] sm:$0xff]  ;;  %v1089_v10 = vld [vmem:[%s6949_s9 + $0x1b0] sm:$0xff] }
 0x348   :  { %v1026_v15 = vmul.f32 0.2, %v1022_v11  ;;  %v1024_v16 = vmul.f32 0.2, %v1020_v12  ;;  %v1023_v17 = vmul.f32 0.2, %v1019_v13 }
 0x349   :  { %v1025_v18 = vmul.f32 0.2, %v1021_v14  ;;  %v1116_v60 = vld [vmem:[%s6949_s9 + $0x288] sm:$0xff] }
 0x34a   :  { %v1028_v19 = vmax.f32 %v1020_v12, %v1024_v16  ;;  %v1030_v20 = vmax.f32 %v1022_v11, %v1026_v15  ;;  %v1027_v21 = vmax.f32 %v1019_v13, %v1023_v17  ;;  %v4388_v11 = vcombine.low %v1076_v5, %v1080_v6  ;;  %v1092_v15 = vld [vmem:[%s6949_s9 + $0x1c8] sm:$0xff]  ;;  %v1093_v17 = vld [vmem:[%s6949_s9 + $0x1d0] sm:$0xff] }
 0x34b   :  { %v1029_v23 = vmax.f32 %v1021_v14, %v1025_v18  ;;  %v4390_v12 = vcombine.low %v1077_v7, %v1081_v3  ;;  %v4397_v13 = vcombine.high %v1084_v58, %v1088_v55  ;;  %v4399_v14 = vcombine.high %v1085_v42, %v1089_v10  ;;  %v1096_v16 = vld [vmem:[%s6949_s9 + $0x1e8] sm:$0xff]  ;;  %v1097_v18 = vld [vmem:[%s6949_s9 + $0x1f0] sm:$0xff] }
 0x34c   :  { %v5794_v28 = vpack.c.bf16 %v1028_v19, %v1028_v19  ;;  %v5796_v30 = vpack.c.bf16 %v1030_v20, %v1030_v20  ;;  %v5798_v31 = vpack.c.bf16 %v1027_v21, %v1027_v21  ;;  %v4396_v19 = vcombine.low %v1084_v58, %v1088_v55  ;;  %v1120_v61 = vld [vmem:[%s6949_s9 + $0x2a8] sm:$0xff] }
 0x34d   :  { %v5800_v32 = vpack.c.bf16 %v1029_v23, %v1029_v23  ;;  %v4398_v20 = vcombine.low %v1085_v42, %v1089_v10  ;;  %v4405_v21 = vcombine.high %v1092_v15, %v1096_v16  ;;  %v4407_v22 = vcombine.high %v1093_v17, %v1097_v18  ;;  %v1100_v23 = vld [vmem:[%s6949_s9 + $0x208] sm:$0xff] }
 0x34e   :  { %2603 = vmatprep.mubr.bf16.mxu1 %v5794_v28  ;;  %2644 = vmatprep.mubr.bf16.mxu0 %v5796_v30  ;;  %v4404_v33 = vcombine.low %v1092_v15, %v1096_v16  ;;  %v4429_v51 = vcombine.high %v1116_v60, %v1120_v61  ;;  %v1124_v56 = vld [vmem:[%s6949_s9 + $0x2c8] sm:$0xff] }
 0x34f   :  { %2604 = vmatmul.mubr.bf16.vlgmr.msra.gmra.mrb[12].mxu1 %v5798_v31  ;;  %2645 = vmatmul.mubr.bf16.vlgmr.msra.gmra.mrb[4].mxu0 %v5800_v32  ;;  %v1128_v57 = vld [vmem:[%s6949_s9 + $0x2e8] sm:$0xff] }
 0x350   :  { %2654 = vmatpush1.bf16.msra.mxu1 %v4348_v8  ;;  %2736 = vmatpush1.bf16.msra.mxu0 %v4350_v9  ;;  %v4366_v8 = vcombine.low %v1053_v37, %v1057_v38  ;;  %v4373_v9 = vcombine.high %v1060_v49, %v1064_v59  ;;  %v1108_v37 = vld [vmem:[%s6949_s9 + $0x248] sm:$0xff]  ;;  %v4437_v5 = vcombine.high %v1124_v56, %v1128_v57 }
 0x351   :  { %2685 = vmatprep.mubr.bf16.mxu1 %v5794_v28  ;;  %2767 = vmatprep.mubr.bf16.mxu0 %v5794_v28  ;;  %v1112_v38 = vld [vmem:[%s6949_s9 + $0x268] sm:$0xff] }
 0x352   :  { %2655 = vmatprep.subr.bf16.mxu1 %v4357_v34  ;;  %2737 = vmatprep.subr.bf16.mxu0 %v4359_v35  ;;  %v4406_v34 = vcombine.low %v1093_v17, %v1097_v18  ;;  %v4413_v35 = vcombine.high %v1100_v23, %v1104_v24  ;;  %v4421_v49 = vcombine.high %v1108_v37, %v1112_v38  ;;  %v1132_v7 = vld [vmem:[%s6949_s9 + $0x308] sm:$0xff] }
 0x353   :  { %v1136_v3 = vld [vmem:[%s6949_s9 + $0x328] sm:$0xff] }
 0x354   :  { %2656 = vmatpush1.bf16.msra.mxu1 %v4356_v39  ;;  %2738 = vmatpush1.bf16.msra.mxu0 %v4358_v45  ;;  %v1109_v39 = vld [vmem:[%s6949_s9 + $0x250] sm:$0xff]  ;;  %v4445_v58 = vcombine.high %v1132_v7, %v1136_v3  ;;  %v1140_v42 = vld [vmem:[%s6949_s9 + $0x348] sm:$0xff] }
 0x355   :  { %2657 = vmatprep.subr.bf16.mxu1 %v4365_v48  ;;  %2739 = vmatprep.subr.bf16.mxu0 %v4367_v41  ;;  %v1113_v45 = vld [vmem:[%s6949_s9 + $0x270] sm:$0xff]  ;;  %v4412_v48 = vcombine.low %v1100_v23, %v1104_v24  ;;  %v4414_v41 = vcombine.low %v1101_v25, %v1105_v26  ;;  %v1144_v10 = vld [vmem:[%s6949_s9 + $0x368] sm:$0xff] }
 0x356   :  { %v4423_v59 = vcombine.high %v1109_v39, %v1113_v45  ;;  %v4453_v15 = vcombine.high %v1140_v42, %v1144_v10  ;;  %v1148_v17 = vld [vmem:[%s6949_s9 + $0x388] sm:$0xff] }
 0x357   :  { %v1152_v18 = vld [vmem:[%s6949_s9 + $0x3a8] sm:$0xff] }
 0x358   :  { %2658 = vmatpush1.bf16.msra.mxu1 %v4364_v4  ;;  %2740 = vmatpush1.bf16.msra.mxu0 %v4366_v8  ;;  %v1117_v4 = vld [vmem:[%s6949_s9 + $0x290] sm:$0xff]  ;;  %v4461_v23 = vcombine.high %v1148_v17, %v1152_v18  ;;  %v1156_v25 = vld [vmem:[%s6949_s9 + $0x3c8] sm:$0xff] }
 0x359   :  { %2659 = vmatprep.subr.bf16.mxu1 %v4373_v9  ;;  %2741 = vmatprep.subr.bf16.mxu0 %v4375_v50  ;;  %v1121_v8 = vld [vmem:[%s6949_s9 + $0x2b0] sm:$0xff]  ;;  %v4420_v9 = vcombine.low %v1108_v37, %v1112_v38  ;;  %v4422_v50 = vcombine.low %v1109_v39, %v1113_v45  ;;  %v1160_v26 = vld [vmem:[%s6949_s9 + $0x3e8] sm:$0xff] }
 0x35a   :  { %v4431_v54 = vcombine.high %v1117_v4, %v1121_v8  ;;  %v4469_v37 = vcombine.high %v1156_v25, %v1160_v26  ;;  %v1164_v39 = vld [vmem:[%s6949_s9 + $0x408] sm:$0xff] }
 0x35b   :  { %v1168_v45 = vld [vmem:[%s6949_s9 + $0x428] sm:$0xff] }
 0x35c   :  { %2660 = vmatpush1.bf16.msra.mxu1 %v4372_v62  ;;  %2742 = vmatpush1.bf16.msra.mxu0 %v4374_v63  ;;  %v1125_v62 = vld [vmem:[%s6949_s9 + $0x2d0] sm:$0xff] }
 0x35d   :  { %2661 = vmatprep.subr.bf16.mxu1 %v4381_v1  ;;  %2743 = vmatprep.subr.bf16.mxu0 %v4383_v2  ;;  %v1129_v63 = vld [vmem:[%s6949_s9 + $0x2f0] sm:$0xff]  ;;  %v4428_v1 = vcombine.low %v1116_v60, %v1120_v61  ;;  %v4430_v2 = vcombine.low %v1117_v4, %v1121_v8  ;;  %v4477_v60 = vcombine.high %v1164_v39, %v1168_v45  ;;  %v1172_v4 = vld [vmem:[%s6949_s9 + $0x448] sm:$0xff] }
 0x35e   :  { %v4439_v6 = vcombine.high %v1125_v62, %v1129_v63  ;;  %v1176_v8 = vld [vmem:[%s6949_s9 + $0x468] sm:$0xff] }
 0x360   :  { %2662 = vmatpush1.bf16.msra.mxu1 %v4380_v0  ;;  %2744 = vmatpush1.bf16.msra.mxu0 %v4382_v27  ;;  %v1133_v0 = vld [vmem:[%s6949_s9 + $0x310] sm:$0xff] }
 0x361   :  { %2663 = vmatprep.subr.bf16.mxu1 %v4389_v29  ;;  %2745 = vmatprep.subr.bf16.mxu0 %v4391_v47  ;;  %v1137_v27 = vld [vmem:[%s6949_s9 + $0x330] sm:$0xff]  ;;  %v4436_v29 = vcombine.low %v1124_v56, %v1128_v57  ;;  %v4438_v47 = vcombine.low %v1125_v62, %v1129_v63  ;;  %v4485_v56 = vcombine.high %v1172_v4, %v1176_v8  ;;  %v1180_v62 = vld [vmem:[%s6949_s9 + $0x488] sm:$0xff] }
 0x362   :  { %v4447_v55 = vcombine.high %v1133_v0, %v1137_v27  ;;  %v1184_v63 = vld [vmem:[%s6949_s9 + $0x4a8] sm:$0xff] }
 0x364   :  { %2664 = vmatpush1.bf16.msra.mxu1 %v4388_v11  ;;  %2746 = vmatpush1.bf16.msra.mxu0 %v4390_v12  ;;  %v1141_v11 = vld [vmem:[%s6949_s9 + $0x350] sm:$0xff] }
 0x365   :  { %2665 = vmatprep.subr.bf16.mxu1 %v4397_v13  ;;  %2747 = vmatprep.subr.bf16.mxu0 %v4399_v14  ;;  %v1145_v12 = vld [vmem:[%s6949_s9 + $0x370] sm:$0xff]  ;;  %v4444_v13 = vcombine.low %v1132_v7, %v1136_v3  ;;  %v4446_v14 = vcombine.low %v1133_v0, %v1137_v27  ;;  %v4493_v7 = vcombine.high %v1180_v62, %v1184_v63  ;;  %v1188_v0 = vld [vmem:[%s6949_s9 + $0x4c8] sm:$0xff] }
 0x366   :  { %v4455_v16 = vcombine.high %v1141_v11, %v1145_v12  ;;  %v1192_v27 = vld [vmem:[%s6949_s9 + $0x4e8] sm:$0xff] }
 0x368   :  { %2666 = vmatpush1.bf16.msra.mxu1 %v4396_v19  ;;  %2748 = vmatpush1.bf16.msra.mxu0 %v4398_v20  ;;  %v1149_v19 = vld [vmem:[%s6949_s9 + $0x390] sm:$0xff] }
 0x369   :  { %2667 = vmatprep.subr.bf16.mxu1 %v4405_v21  ;;  %2749 = vmatprep.subr.bf16.mxu0 %v4407_v22  ;;  %v1153_v20 = vld [vmem:[%s6949_s9 + $0x3b0] sm:$0xff]  ;;  %v4452_v21 = vcombine.low %v1140_v42, %v1144_v10  ;;  %v4454_v22 = vcombine.low %v1141_v11, %v1145_v12  ;;  %v4501_v42 = vcombine.high %v1188_v0, %v1192_v27  ;;  %v1196_v11 = vld [vmem:[%s6949_s9 + $0x508] sm:$0xff] }
 0x36a   :  { %v4463_v24 = vcombine.high %v1149_v19, %v1153_v20  ;;  %v1200_v12 = vld [vmem:[%s6949_s9 + $0x528] sm:$0xff] }
 0x36c   :  { %2668 = vmatpush1.bf16.msra.mxu1 %v4404_v33  ;;  %2750 = vmatpush1.bf16.msra.mxu0 %v4406_v34  ;;  %v1157_v33 = vld [vmem:[%s6949_s9 + $0x3d0] sm:$0xff] }
 0x36d   :  { %2669 = vmatprep.subr.bf16.mxu1 %v4413_v35  ;;  %2751 = vmatprep.subr.bf16.mxu0 %v4415_v36  ;;  %v1161_v34 = vld [vmem:[%s6949_s9 + $0x3f0] sm:$0xff]  ;;  %v4460_v35 = vcombine.low %v1148_v17, %v1152_v18  ;;  %v4462_v36 = vcombine.low %v1149_v19, %v1153_v20  ;;  %v4509_v17 = vcombine.high %v1196_v11, %v1200_v12  ;;  %v1204_v19 = vld [vmem:[%s6949_s9 + $0x548] sm:$0xff] }
 0x36e   :  { %v4471_v38 = vcombine.high %v1157_v33, %v1161_v34  ;;  %v1208_v20 = vld [vmem:[%s6949_s9 + $0x568] sm:$0xff] }
 0x370   :  { %2670 = vmatpush1.bf16.msra.mxu1 %v4412_v48  ;;  %2752 = vmatpush1.bf16.msra.mxu0 %v4414_v41  ;;  %v1165_v48 = vld [vmem:[%s6949_s9 + $0x410] sm:$0xff] }
 0x371   :  { %2671 = vmatprep.subr.bf16.mxu1 %v4421_v49  ;;  %2753 = vmatprep.subr.bf16.mxu0 %v4423_v59  ;;  %v1169_v41 = vld [vmem:[%s6949_s9 + $0x430] sm:$0xff]  ;;  %v4468_v49 = vcombine.low %v1156_v25, %v1160_v26  ;;  %v4470_v59 = vcombine.low %v1157_v33, %v1161_v34  ;;  %v4517_v25 = vcombine.high %v1204_v19, %v1208_v20  ;;  %v1212_v33 = vld [vmem:[%s6949_s9 + $0x588] sm:$0xff] }
 0x372   :  { %v4479_v61 = vcombine.high %v1165_v48, %v1169_v41  ;;  %v1216_v34 = vld [vmem:[%s6949_s9 + $0x5a8] sm:$0xff] }
 0x374   :  { %2672 = vmatpush1.bf16.msra.mxu1 %v4420_v9  ;;  %2754 = vmatpush1.bf16.msra.mxu0 %v4422_v50  ;;  %v1173_v9 = vld [vmem:[%s6949_s9 + $0x450] sm:$0xff] }
 0x375   :  { %2673 = vmatprep.subr.bf16.mxu1 %v4429_v51  ;;  %2755 = vmatprep.subr.bf16.mxu0 %v4431_v54  ;;  %v1177_v50 = vld [vmem:[%s6949_s9 + $0x470] sm:$0xff]  ;;  %v4476_v51 = vcombine.low %v1164_v39, %v1168_v45  ;;  %v4478_v54 = vcombine.low %v1165_v48, %v1169_v41  ;;  %v4525_v39 = vcombine.high %v1212_v33, %v1216_v34  ;;  %v1220_v48 = vld [vmem:[%s6949_s9 + $0x5c8] sm:$0xff] }
 0x376   :  { %v4487_v57 = vcombine.high %v1173_v9, %v1177_v50  ;;  %v1224_v41 = vld [vmem:[%s6949_s9 + $0x5e8] sm:$0xff] }
 0x378   :  { %2674 = vmatpush1.bf16.msra.mxu1 %v4428_v1  ;;  %2756 = vmatpush1.bf16.msra.mxu0 %v4430_v2  ;;  %v1181_v1 = vld [vmem:[%s6949_s9 + $0x490] sm:$0xff] }
 0x379   :  { %2675 = vmatprep.subr.bf16.mxu1 %v4437_v5  ;;  %2757 = vmatprep.subr.bf16.mxu0 %v4439_v6  ;;  %v1185_v2 = vld [vmem:[%s6949_s9 + $0x4b0] sm:$0xff]  ;;  %v4484_v5 = vcombine.low %v1172_v4, %v1176_v8  ;;  %v4486_v6 = vcombine.low %v1173_v9, %v1177_v50  ;;  %v4533_v4 = vcombine.high %v1220_v48, %v1224_v41  ;;  %v1228_v9 = vld [vmem:[%s6949_s9 + $0x608] sm:$0xff] }
 0x37a   :  { %v4495_v3 = vcombine.high %v1181_v1, %v1185_v2  ;;  %v1232_v50 = vld [vmem:[%s6949_s9 + $0x628] sm:$0xff] }
 0x37c   :  { %2676 = vmatpush1.bf16.msra.mxu1 %v4436_v29  ;;  %2758 = vmatpush1.bf16.msra.mxu0 %v4438_v47  ;;  %v1189_v29 = vld [vmem:[%s6949_s9 + $0x4d0] sm:$0xff] }
 0x37d   :  { %2677 = vmatprep.subr.bf16.mxu1 %v4445_v58  ;;  %2759 = vmatprep.subr.bf16.mxu0 %v4447_v55  ;;  %v1193_v47 = vld [vmem:[%s6949_s9 + $0x4f0] sm:$0xff]  ;;  %v4492_v58 = vcombine.low %v1180_v62, %v1184_v63  ;;  %v4494_v55 = vcombine.low %v1181_v1, %v1185_v2  ;;  %v4541_v62 = vcombine.high %v1228_v9, %v1232_v50  ;;  %v1236_v1 = vld [vmem:[%s6949_s9 + $0x648] sm:$0xff] }
 0x37e   :  { %v4503_v10 = vcombine.high %v1189_v29, %v1193_v47  ;;  %v1240_v2 = vld [vmem:[%s6949_s9 + $0x668] sm:$0xff] }
 0x380   :  { %2678 = vmatpush1.bf16.msra.mxu1 %v4444_v13  ;;  %2760 = vmatpush1.bf16.msra.mxu0 %v4446_v14  ;;  %v1197_v13 = vld [vmem:[%s6949_s9 + $0x510] sm:$0xff] }
 0x381   :  { %2679 = vmatprep.subr.bf16.mxu1 %v4453_v15  ;;  %2761 = vmatprep.subr.bf16.mxu0 %v4455_v16  ;;  %v1201_v14 = vld [vmem:[%s6949_s9 + $0x530] sm:$0xff]  ;;  %v4500_v15 = vcombine.low %v1188_v0, %v1192_v27  ;;  %v4502_v16 = vcombine.low %v1189_v29, %v1193_v47  ;;  %v4549_v0 = vcombine.high %v1236_v1, %v1240_v2  ;;  %v1244_v29 = vld [vmem:[%s6949_s9 + $0x688] sm:$0xff] }
 0x382   :  { %v4511_v18 = vcombine.high %v1197_v13, %v1201_v14  ;;  %v1248_v47 = vld [vmem:[%s6949_s9 + $0x6a8] sm:$0xff] }
 0x384   :  { %2680 = vmatpush1.bf16.msra.mxu1 %v4452_v21  ;;  %2762 = vmatpush1.bf16.msra.mxu0 %v4454_v22  ;;  %v1205_v21 = vld [vmem:[%s6949_s9 + $0x550] sm:$0xff] }
 0x385   :  { %2681 = vmatprep.subr.bf16.mxu1 %v4461_v23  ;;  %2763 = vmatprep.subr.bf16.mxu0 %v4463_v24  ;;  %v1209_v22 = vld [vmem:[%s6949_s9 + $0x570] sm:$0xff]  ;;  %v4508_v23 = vcombine.low %v1196_v11, %v1200_v12  ;;  %v4510_v24 = vcombine.low %v1197_v13, %v1201_v14  ;;  %v4557_v11 = vcombine.high %v1244_v29, %v1248_v47  ;;  %v1252_v13 = vld [vmem:[%s6949_s9 + $0x6c8] sm:$0xff] }
 0x386   :  { %v4519_v26 = vcombine.high %v1205_v21, %v1209_v22  ;;  %v1256_v14 = vld [vmem:[%s6949_s9 + $0x6e8] sm:$0xff] }
 0x388   :  { %2682 = vmatpush1.bf16.msra.mxu1 %v4460_v35  ;;  %2764 = vmatpush1.bf16.msra.mxu0 %v4462_v36  ;;  %v1213_v35 = vld [vmem:[%s6949_s9 + $0x590] sm:$0xff] }
 0x389   :  { %2683 = vmatprep.subr.bf16.mxu1 %v4469_v37  ;;  %2765 = vmatprep.subr.bf16.mxu0 %v4471_v38  ;;  %v1217_v36 = vld [vmem:[%s6949_s9 + $0x5b0] sm:$0xff]  ;;  %v4516_v37 = vcombine.low %v1204_v19, %v1208_v20  ;;  %v4518_v38 = vcombine.low %v1205_v21, %v1209_v22  ;;  %v4565_v19 = vcombine.high %v1252_v13, %v1256_v14  ;;  %v1260_v21 = vld [vmem:[%s6949_s9 + $0x708] sm:$0xff] }
 0x38a   :  { %v4527_v45 = vcombine.high %v1213_v35, %v1217_v36  ;;  %v1264_v22 = vld [vmem:[%s6949_s9 + $0x728] sm:$0xff] }
 0x38c   :  { %2684 = vmatpush1.bf16.msra.mxu1 %v4468_v49  ;;  %2766 = vmatpush1.bf16.msra.mxu0 %v4470_v59  ;;  %v1221_v49 = vld [vmem:[%s6949_s9 + $0x5d0] sm:$0xff] }
 0x38d   :  { %2694 = vmatprep.subr.bf16.mxu1 %v4477_v60  ;;  %2776 = vmatprep.subr.bf16.mxu0 %v4479_v61  ;;  %v1225_v59 = vld [vmem:[%s6949_s9 + $0x5f0] sm:$0xff]  ;;  %v4524_v60 = vcombine.low %v1212_v33, %v1216_v34  ;;  %v4526_v61 = vcombine.low %v1213_v35, %v1217_v36  ;;  %v4573_v33 = vcombine.high %v1260_v21, %v1264_v22  ;;  %v1268_v35 = vld [vmem:[%s6949_s9 + $0x748] sm:$0xff] }
 0x38e   :  { %v4535_v8 = vcombine.high %v1221_v49, %v1225_v59  ;;  %v1272_v36 = vld [vmem:[%s6949_s9 + $0x768] sm:$0xff] }
 0x38f   :  { %2686 = vmatmul.mubr.bf16.vlgmr.msra.gmra.mrb[16].mxu1 %v5798_v31  ;;  %2768 = vmatmul.mubr.bf16.vlgmr.msra.gmra.mrb[8].mxu0 %v5798_v31 }
 0x390   :  { %2695 = vmatpush1.bf16.msra.mxu1 %v4476_v51  ;;  %2726 = vmatprep.mubr.bf16.mxu1 %v5796_v30  ;;  %v1229_v51 = vld [vmem:[%s6949_s9 + $0x610] sm:$0xff] }
 0x391   :  { %2777 = vmatpush1.bf16.msra.mxu0 %v4478_v54  ;;  %2808 = vmatprep.mubr.bf16.mxu0 %v5796_v30  ;;  %v1233_v54 = vld [vmem:[%s6949_s9 + $0x630] sm:$0xff] }
 0x392   :  { %2696 = vmatprep.subr.bf16.mxu1 %v4485_v56  ;;  %2778 = vmatprep.subr.bf16.mxu0 %v4487_v57  ;;  %v4532_v56 = vcombine.low %v1220_v48, %v1224_v41  ;;  %v4534_v57 = vcombine.low %v1221_v49, %v1225_v59  ;;  %v4543_v63 = vcombine.high %v1229_v51, %v1233_v54  ;;  %v1276_v49 = vld [vmem:[%s6949_s9 + $0x788] sm:$0xff] }
 0x393   :  { %v4581_v48 = vcombine.high %v1268_v35, %v1272_v36  ;;  %v1280_v59 = vld [vmem:[%s6949_s9 + $0x7a8] sm:$0xff] }
 0x394   :  { %2697 = vmatpush1.bf16.msra.mxu1 %v4484_v5  ;;  %v1237_v5 = vld [vmem:[%s6949_s9 + $0x650] sm:$0xff] }
 0x395   :  { %2779 = vmatpush1.bf16.msra.mxu0 %v4486_v6  ;;  %2698 = vmatprep.subr.bf16.mxu1 %v4493_v7  ;;  %v1241_v6 = vld [vmem:[%s6949_s9 + $0x670] sm:$0xff]  ;;  %v4540_v7 = vcombine.low %v1228_v9, %v1232_v50  ;;  %v4589_v9 = vcombine.high %v1276_v49, %v1280_v59 }
 0x396   :  { %2780 = vmatprep.subr.bf16.mxu0 %v4495_v3  ;;  %v4542_v3 = vcombine.low %v1229_v51, %v1233_v54  ;;  %v4551_v27 = vcombine.high %v1237_v5, %v1241_v6  ;;  %v1284_v51 = vld [vmem:[%s6949_s9 + $0x7c8] sm:$0xff] }
 0x397   :  { %v1288_v54 = vld [vmem:[%s6949_s9 + $0x7e8] sm:$0xff] }
 0x398   :  { %2699 = vmatpush1.bf16.msra.mxu1 %v4492_v58  ;;  %v1245_v58 = vld [vmem:[%s6949_s9 + $0x690] sm:$0xff] }
 0x399   :  { %2781 = vmatpush1.bf16.msra.mxu0 %v4494_v55  ;;  %2700 = vmatprep.subr.bf16.mxu1 %v4501_v42  ;;  %v1249_v55 = vld [vmem:[%s6949_s9 + $0x6b0] sm:$0xff]  ;;  %v4548_v42 = vcombine.low %v1236_v1, %v1240_v2  ;;  %v4597_v1 = vcombine.high %v1284_v51, %v1288_v54 }
 0x39a   :  { %2782 = vmatprep.subr.bf16.mxu0 %v4503_v10  ;;  %v4550_v10 = vcombine.low %v1237_v5, %v1241_v6  ;;  %v4559_v12 = vcombine.high %v1245_v58, %v1249_v55  ;;  %v1038_v5 = vld [vmem:[%s6949_s9 + $0x18] sm:$0xff] }
 0x39b   :  { %v1042_v6 = vld [vmem:[%s6949_s9 + $0x38] sm:$0xff] }
 0x39c   :  { %2701 = vmatpush1.bf16.msra.mxu1 %v4500_v15  ;;  %v1253_v15 = vld [vmem:[%s6949_s9 + $0x6d0] sm:$0xff] }
 0x39d   :  { %2783 = vmatpush1.bf16.msra.mxu0 %v4502_v16  ;;  %2702 = vmatprep.subr.bf16.mxu1 %v4509_v17  ;;  %v1257_v16 = vld [vmem:[%s6949_s9 + $0x6f0] sm:$0xff]  ;;  %v4556_v17 = vcombine.low %v1244_v29, %v1248_v47  ;;  %v1050_v29 = vld [vmem:[%s6949_s9 + $0x78] sm:$0xff]  ;;  %v4352_v47 = vcombine.low %v1038_v5, %v1042_v6 }
 0x39e   :  { %2784 = vmatprep.subr.bf16.mxu0 %v4511_v18  ;;  %v4558_v18 = vcombine.low %v1245_v58, %v1249_v55  ;;  %v4567_v20 = vcombine.high %v1253_v15, %v1257_v16  ;;  %v1054_v55 = vld [vmem:[%s6949_s9 + $0x98] sm:$0xff] }
 0x3a0   :  { %2703 = vmatpush1.bf16.msra.mxu1 %v4508_v23  ;;  %v1261_v23 = vld [vmem:[%s6949_s9 + $0x710] sm:$0xff] }
 0x3a1   :  { %2785 = vmatpush1.bf16.msra.mxu0 %v4510_v24  ;;  %2704 = vmatprep.subr.bf16.mxu1 %v4517_v25  ;;  %v1265_v24 = vld [vmem:[%s6949_s9 + $0x730] sm:$0xff]  ;;  %v4564_v25 = vcombine.low %v1252_v13, %v1256_v14  ;;  %v1066_v13 = vld [vmem:[%s6949_s9 + $0xf8] sm:$0xff] }
 0x3a2   :  { %2786 = vmatprep.subr.bf16.mxu0 %v4519_v26  ;;  %v4566_v26 = vcombine.low %v1253_v15, %v1257_v16  ;;  %v4575_v34 = vcombine.high %v1261_v23, %v1265_v24  ;;  %v1070_v16 = vld [vmem:[%s6949_s9 + $0x118] sm:$0xff] }
 0x3a4   :  { %2705 = vmatpush1.bf16.msra.mxu1 %v4516_v37  ;;  %v1269_v37 = vld [vmem:[%s6949_s9 + $0x750] sm:$0xff] }
 0x3a5   :  { %2787 = vmatpush1.bf16.msra.mxu0 %v4518_v38  ;;  %2706 = vmatprep.subr.bf16.mxu1 %v4525_v39  ;;  %v1273_v38 = vld [vmem:[%s6949_s9 + $0x770] sm:$0xff]  ;;  %v4572_v39 = vcombine.low %v1260_v21, %v1264_v22 }
 0x3a6   :  { %2788 = vmatprep.subr.bf16.mxu0 %v4527_v45  ;;  %v4574_v45 = vcombine.low %v1261_v23, %v1265_v24  ;;  %v4583_v41 = vcombine.high %v1269_v37, %v1273_v38  ;;  %v1086_v23 = vld [vmem:[%s6949_s9 + $0x198] sm:$0xff] }
 0x3a7   :  { %v1090_v24 = vld [vmem:[%s6949_s9 + $0x1b8] sm:$0xff] }
 0x3a8   :  { %2707 = vmatpush1.bf16.msra.mxu1 %v4524_v60  ;;  %v1277_v60 = vld [vmem:[%s6949_s9 + $0x790] sm:$0xff] }
 0x3a9   :  { %2789 = vmatpush1.bf16.msra.mxu0 %v4526_v61  ;;  %2708 = vmatprep.subr.bf16.mxu1 %v4533_v4  ;;  %v1281_v61 = vld [vmem:[%s6949_s9 + $0x7b0] sm:$0xff]  ;;  %v4580_v4 = vcombine.low %v1268_v35, %v1272_v36  ;;  %v4400_v35 = vcombine.low %v1086_v23, %v1090_v24 }
 0x3aa   :  { %2790 = vmatprep.subr.bf16.mxu0 %v4535_v8  ;;  %v4582_v8 = vcombine.low %v1269_v37, %v1273_v38  ;;  %v4591_v50 = vcombine.high %v1277_v60, %v1281_v61  ;;  %v1102_v37 = vld [vmem:[%s6949_s9 + $0x218] sm:$0xff] }
 0x3ab   :  { %v1106_v38 = vld [vmem:[%s6949_s9 + $0x238] sm:$0xff] }
 0x3ac   :  { %2709 = vmatpush1.bf16.msra.mxu1 %v4532_v56  ;;  %v1285_v56 = vld [vmem:[%s6949_s9 + $0x7d0] sm:$0xff] }
 0x3ad   :  { %2791 = vmatpush1.bf16.msra.mxu0 %v4534_v57  ;;  %2710 = vmatprep.subr.bf16.mxu1 %v4541_v62  ;;  %v1289_v57 = vld [vmem:[%s6949_s9 + $0x7f0] sm:$0xff]  ;;  %v4588_v62 = vcombine.low %v1276_v49, %v1280_v59  ;;  %v4416_v49 = vcombine.low %v1102_v37, %v1106_v38 }
 0x3ae   :  { %2792 = vmatprep.subr.bf16.mxu0 %v4543_v63  ;;  %v4590_v63 = vcombine.low %v1277_v60, %v1281_v61  ;;  %v4599_v2 = vcombine.high %v1285_v56, %v1289_v57  ;;  %v1118_v60 = vld [vmem:[%s6949_s9 + $0x298] sm:$0xff] }
 0x3af   :  { %v1122_v61 = vld [vmem:[%s6949_s9 + $0x2b8] sm:$0xff] }
 0x3b0   :  { %2711 = vmatpush1.bf16.msra.mxu1 %v4540_v7  ;;  %v4596_v7 = vcombine.low %v1284_v51, %v1288_v54  ;;  %v4432_v51 = vcombine.low %v1118_v60, %v1122_v61 }
 0x3b1   :  { %2793 = vmatpush1.bf16.msra.mxu0 %v4542_v3  ;;  %2712 = vmatprep.subr.bf16.mxu1 %v4549_v0  ;;  %v4598_v3 = vcombine.low %v1285_v56, %v1289_v57  ;;  %v4353_v0 = vcombine.high %v1038_v5, %v1042_v6  ;;  %v1134_v56 = vld [vmem:[%s6949_s9 + $0x318] sm:$0xff] }
 0x3b2   :  { %2794 = vmatprep.subr.bf16.mxu0 %v4551_v27  ;;  %v1046_v27 = vld [vmem:[%s6949_s9 + $0x58] sm:$0xff] }
 0x3b3   :  { %v4361_v58 = vcombine.high %v1046_v27, %v1050_v29  ;;  %v1138_v57 = vld [vmem:[%s6949_s9 + $0x338] sm:$0xff] }
 0x3b4   :  { %2713 = vmatpush1.bf16.msra.mxu1 %v4548_v42  ;;  %v1058_v42 = vld [vmem:[%s6949_s9 + $0xb8] sm:$0xff]  ;;  %v4448_v5 = vcombine.low %v1134_v56, %v1138_v57 }
 0x3b5   :  { %2795 = vmatpush1.bf16.msra.mxu0 %v4550_v10  ;;  %2714 = vmatprep.subr.bf16.mxu1 %v4557_v11  ;;  %v4360_v10 = vcombine.low %v1046_v27, %v1050_v29  ;;  %v4369_v11 = vcombine.high %v1054_v55, %v1058_v42  ;;  %v4368_v14 = vcombine.low %v1054_v55, %v1058_v42  ;;  %v1158_v29 = vld [vmem:[%s6949_s9 + $0x3d8] sm:$0xff] }
 0x3b6   :  { %2796 = vmatprep.subr.bf16.mxu0 %v4559_v12  ;;  %v1062_v12 = vld [vmem:[%s6949_s9 + $0xd8] sm:$0xff] }
 0x3b7   :  { %v4377_v15 = vcombine.high %v1062_v12, %v1066_v13  ;;  %v1166_v42 = vld [vmem:[%s6949_s9 + $0x418] sm:$0xff] }
 0x3b8   :  { %2715 = vmatpush1.bf16.msra.mxu1 %v4556_v17  ;;  %v4376_v17 = vcombine.low %v1062_v12, %v1066_v13  ;;  %v1174_v13 = vld [vmem:[%s6949_s9 + $0x458] sm:$0xff] }
 0x3b9   :  { %2797 = vmatpush1.bf16.msra.mxu0 %v4558_v18  ;;  %2716 = vmatprep.subr.bf16.mxu1 %v4565_v19  ;;  %v1078_v19 = vld [vmem:[%s6949_s9 + $0x158] sm:$0xff] }
 0x3ba   :  { %2798 = vmatprep.subr.bf16.mxu0 %v4567_v20  ;;  %v1082_v20 = vld [vmem:[%s6949_s9 + $0x178] sm:$0xff] }
 0x3bb   :  { %v4393_v22 = vcombine.high %v1078_v19, %v1082_v20 }
 0x3bc   :  { %2717 = vmatpush1.bf16.msra.mxu1 %v4564_v25  ;;  %v4392_v25 = vcombine.low %v1078_v19, %v1082_v20  ;;  %v1190_v20 = vld [vmem:[%s6949_s9 + $0x4d8] sm:$0xff] }
 0x3bd   :  { %2799 = vmatpush1.bf16.msra.mxu0 %v4566_v26  ;;  %2718 = vmatprep.subr.bf16.mxu1 %v4573_v33  ;;  %v4401_v26 = vcombine.high %v1086_v23, %v1090_v24  ;;  %v1094_v33 = vld [vmem:[%s6949_s9 + $0x1d8] sm:$0xff] }
 0x3be   :  { %2800 = vmatprep.subr.bf16.mxu0 %v4575_v34  ;;  %v1098_v34 = vld [vmem:[%s6949_s9 + $0x1f8] sm:$0xff] }
 0x3bf   :  { %v4409_v36 = vcombine.high %v1094_v33, %v1098_v34 }
 0x3c0   :  { %2719 = vmatpush1.bf16.msra.mxu1 %v4572_v39  ;;  %v4408_v39 = vcombine.low %v1094_v33, %v1098_v34  ;;  %v1210_v33 = vld [vmem:[%s6949_s9 + $0x578] sm:$0xff] }
 0x3c1   :  { %2801 = vmatpush1.bf16.msra.mxu0 %v4574_v45  ;;  %2720 = vmatprep.subr.bf16.mxu1 %v4581_v48  ;;  %v4417_v45 = vcombine.high %v1102_v37, %v1106_v38  ;;  %v1110_v48 = vld [vmem:[%s6949_s9 + $0x258] sm:$0xff] }
 0x3c2   :  { %2802 = vmatprep.subr.bf16.mxu0 %v4583_v41  ;;  %v1114_v41 = vld [vmem:[%s6949_s9 + $0x278] sm:$0xff] }
 0x3c3   :  { %v4425_v59 = vcombine.high %v1110_v48, %v1114_v41  ;;  %v1218_v37 = vld [vmem:[%s6949_s9 + $0x5b8] sm:$0xff] }
 0x3c4   :  { %2721 = vmatpush1.bf16.msra.mxu1 %v4580_v4  ;;  %v4424_v4 = vcombine.low %v1110_v48, %v1114_v41  ;;  %v1222_v41 = vld [vmem:[%s6949_s9 + $0x5d8] sm:$0xff] }
 0x3c5   :  { %2803 = vmatpush1.bf16.msra.mxu0 %v4582_v8  ;;  %2722 = vmatprep.subr.bf16.mxu1 %v4589_v9  ;;  %v4433_v8 = vcombine.high %v1118_v60, %v1122_v61  ;;  %v1126_v9 = vld [vmem:[%s6949_s9 + $0x2d8] sm:$0xff] }
 0x3c6   :  { %2804 = vmatprep.subr.bf16.mxu0 %v4591_v50  ;;  %v1130_v50 = vld [vmem:[%s6949_s9 + $0x2f8] sm:$0xff] }
 0x3c7   :  { %v4441_v54 = vcombine.high %v1126_v9, %v1130_v50 }
 0x3c8   :  { %2723 = vmatpush1.bf16.msra.mxu1 %v4588_v62  ;;  %v4440_v62 = vcombine.low %v1126_v9, %v1130_v50 }
 0x3c9   :  { %2805 = vmatpush1.bf16.msra.mxu0 %v4590_v63  ;;  %2724 = vmatprep.subr.bf16.mxu1 %v4597_v1  ;;  %v4449_v63 = vcombine.high %v1134_v56, %v1138_v57  ;;  %v1142_v1 = vld [vmem:[%s6949_s9 + $0x358] sm:$0xff] }
 0x3ca   :  { %2806 = vmatprep.subr.bf16.mxu0 %v4599_v2  ;;  %v1146_v2 = vld [vmem:[%s6949_s9 + $0x378] sm:$0xff] }
 0x3cb   :  { %v4457_v6 = vcombine.high %v1142_v1, %v1146_v2 }
 0x3cc   :  { %2725 = vmatpush1.bf16.msra.mxu1 %v4596_v7  ;;  %v1150_v7 = vld [vmem:[%s6949_s9 + $0x398] sm:$0xff] }
 0x3cd   :  { %2807 = vmatpush1.bf16.msra.mxu0 %v4598_v3  ;;  %2817 = vmatprep.subr.bf16.mxu1 %v4353_v0  ;;  %v1154_v3 = vld [vmem:[%s6949_s9 + $0x3b8] sm:$0xff]  ;;  %v4456_v0 = vcombine.low %v1142_v1, %v1146_v2 }
 0x3ce   :  { %v4465_v27 = vcombine.high %v1150_v7, %v1154_v3  ;;  %v1230_v2 = vld [vmem:[%s6949_s9 + $0x618] sm:$0xff] }
 0x3cf   :  { %2727 = vmatmul.mubr.bf16.vlgmr.msra.gmra.mrb[16].mxu1 %v5800_v32 }
 0x3d0   :  { %2809 = vmatmul.mubr.bf16.vlgmr.msra.gmra.mrb[8].mxu0 %v5800_v32  ;;  %2818 = vmatpush1.bf16.msra.mxu1 %v4352_v47  ;;  %v1162_v47 = vld [vmem:[%s6949_s9 + $0x3f8] sm:$0xff] }
 0x3d1   :  { %2849 = vmatprep.mubr.bf16.mxu1 %v5794_v28  ;;  %2819 = vmatprep.subr.bf16.mxu1 %v4361_v58  ;;  %v1074_v28 = vld [vmem:[%s6949_s9 + $0x138] sm:$0xff]  ;;  %v4464_v58 = vcombine.low %v1150_v7, %v1154_v3  ;;  %v4473_v55 = vcombine.high %v1158_v29, %v1162_v47 }
 0x3d2   :  { %v4385_v18 = vcombine.high %v1070_v16, %v1074_v28  ;;  %v4384_v21 = vcombine.low %v1070_v16, %v1074_v28  ;;  %v1182_v28 = vld [vmem:[%s6949_s9 + $0x498] sm:$0xff] }
 0x3d4   :  { %2820 = vmatpush1.bf16.msra.mxu1 %v4360_v10  ;;  %v1170_v10 = vld [vmem:[%s6949_s9 + $0x438] sm:$0xff] }
 0x3d5   :  { %2821 = vmatprep.subr.bf16.mxu1 %v4369_v11  ;;  %v4472_v11 = vcombine.low %v1158_v29, %v1162_v47  ;;  %v4481_v12 = vcombine.high %v1166_v42, %v1170_v10 }
 0x3d8   :  { %2822 = vmatpush1.bf16.msra.mxu1 %v4368_v14  ;;  %v1178_v14 = vld [vmem:[%s6949_s9 + $0x478] sm:$0xff] }
 0x3d9   :  { %2823 = vmatprep.subr.bf16.mxu1 %v4377_v15  ;;  %v4480_v15 = vcombine.low %v1166_v42, %v1170_v10  ;;  %v4489_v16 = vcombine.high %v1174_v13, %v1178_v14  ;;  %v1238_v10 = vld [vmem:[%s6949_s9 + $0x658] sm:$0xff] }
 0x3dc   :  { %2824 = vmatpush1.bf16.msra.mxu1 %v4376_v17  ;;  %v1186_v17 = vld [vmem:[%s6949_s9 + $0x4b8] sm:$0xff] }
 0x3dd   :  { %2825 = vmatprep.subr.bf16.mxu1 %v4385_v18  ;;  %v4488_v18 = vcombine.low %v1174_v13, %v1178_v14  ;;  %v4497_v19 = vcombine.high %v1182_v28, %v1186_v17 }
 0x3e0   :  { %2826 = vmatpush1.bf16.msra.mxu1 %v4384_v21  ;;  %v1194_v21 = vld [vmem:[%s6949_s9 + $0x4f8] sm:$0xff] }
 0x3e1   :  { %2827 = vmatprep.subr.bf16.mxu1 %v4393_v22  ;;  %v4496_v22 = vcombine.low %v1182_v28, %v1186_v17  ;;  %v4505_v23 = vcombine.high %v1190_v20, %v1194_v21  ;;  %v4504_v24 = vcombine.low %v1190_v20, %v1194_v21  ;;  %v1246_v21 = vld [vmem:[%s6949_s9 + $0x698] sm:$0xff] }
 0x3e4   :  { %2828 = vmatpush1.bf16.msra.mxu1 %v4392_v25 }
 0x3e5   :  { %2829 = vmatprep.subr.bf16.mxu1 %v4401_v26  ;;  %v1206_v26 = vld [vmem:[%s6949_s9 + $0x558] sm:$0xff] }
 0x3e6   :  { %v4520_v38 = vcombine.low %v1206_v26, %v1210_v33 }
 0x3e8   :  { %2830 = vmatpush1.bf16.msra.mxu1 %v4400_v35  ;;  %v4521_v35 = vcombine.high %v1206_v26, %v1210_v33 }
 0x3e9   :  { %2831 = vmatprep.subr.bf16.mxu1 %v4409_v36  ;;  %v1214_v36 = vld [vmem:[%s6949_s9 + $0x598] sm:$0xff] }
 0x3ea   :  { %v4528_v50 = vcombine.low %v1214_v36, %v1218_v37 }
 0x3ec   :  { %2832 = vmatpush1.bf16.msra.mxu1 %v4408_v39  ;;  %v4529_v39 = vcombine.high %v1214_v36, %v1218_v37  ;;  %v1254_v37 = vld [vmem:[%s6949_s9 + $0x6d8] sm:$0xff] }
 0x3ed   :  { %2833 = vmatprep.subr.bf16.mxu1 %v4417_v45 }
 0x3f0   :  { %2834 = vmatpush1.bf16.msra.mxu1 %v4416_v49  ;;  %v1226_v49 = vld [vmem:[%s6949_s9 + $0x5f8] sm:$0xff] }
 0x3f1   :  { %2835 = vmatprep.subr.bf16.mxu1 %v4425_v59 }
 0x3f4   :  { %2836 = vmatpush1.bf16.msra.mxu1 %v4424_v4 }
 0x3f5   :  { %2837 = vmatprep.subr.bf16.mxu1 %v4433_v8 }
 0x3f8   :  { %2838 = vmatpush1.bf16.msra.mxu1 %v4432_v51 }
 0x3f9   :  { %2839 = vmatprep.subr.bf16.mxu1 %v4441_v54 }
 0x3fc   :  { %2840 = vmatpush1.bf16.msra.mxu1 %v4440_v62  ;;  %v4537_v62 = vcombine.high %v1222_v41, %v1226_v49 }
 0x3fd   :  { %2841 = vmatprep.subr.bf16.mxu1 %v4449_v63 }
 0x400   :  { %2842 = vmatpush1.bf16.msra.mxu1 %v4448_v5  ;;  %v1234_v5 = vld [vmem:[%s6949_s9 + $0x638] sm:$0xff] }
 0x401   :  { %2843 = vmatprep.subr.bf16.mxu1 %v4457_v6 }
 0x404   :  { %2844 = vmatpush1.bf16.msra.mxu1 %v4456_v0 }
 0x405   :  { %2845 = vmatprep.subr.bf16.mxu1 %v4465_v27  ;;  %v4536_v27 = vcombine.low %v1222_v41, %v1226_v49 }
 0x408   :  { %2846 = vmatpush1.bf16.msra.mxu1 %v4464_v58  ;;  %v4545_v58 = vcombine.high %v1230_v2, %v1234_v5 }
 0x409   :  { %2847 = vmatprep.subr.bf16.mxu1 %v4473_v55 }
 0x40c   :  { %2848 = vmatpush1.bf16.msra.mxu1 %v4472_v11  ;;  %v1242_v11 = vld [vmem:[%s6949_s9 + $0x678] sm:$0xff] }
 0x40d   :  { %2858 = vmatprep.subr.bf16.mxu1 %v4481_v12 }
 0x40f   :  { %2850 = vmatmul.mubr.bf16.vlgmr.msra.gmra.mrb[20].mxu1 %v5798_v31  ;;  %v1198_v31 = vld [vmem:[%s6949_s9 + $0x518] sm:$0xff] }
 0x410   :  { %2859 = vmatpush1.bf16.msra.mxu1 %v4480_v15  ;;  %2890 = vmatprep.mubr.bf16.mxu1 %v5796_v30  ;;  %v1202_v30 = vld [vmem:[%s6949_s9 + $0x538] sm:$0xff] }
 0x411   :  { %2860 = vmatprep.subr.bf16.mxu1 %v4489_v16  ;;  %v4513_v25 = vcombine.high %v1198_v31, %v1202_v30  ;;  %v4512_v34 = vcombine.low %v1198_v31, %v1202_v30  ;;  %v4544_v16 = vcombine.low %v1230_v2, %v1234_v5  ;;  %v1278_v5 = vld [vmem:[%s6949_s9 + $0x798] sm:$0xff] }
 0x414   :  { %2861 = vmatpush1.bf16.msra.mxu1 %v4488_v18  ;;  %v4553_v18 = vcombine.high %v1238_v10, %v1242_v11 }
 0x415   :  { %2862 = vmatprep.subr.bf16.mxu1 %v4497_v19 }
 0x418   :  { %2863 = vmatpush1.bf16.msra.mxu1 %v4496_v22  ;;  %v1250_v22 = vld [vmem:[%s6949_s9 + $0x6b8] sm:$0xff] }
 0x419   :  { %2864 = vmatprep.subr.bf16.mxu1 %v4505_v23  ;;  %v4560_v49 = vcombine.low %v1246_v21, %v1250_v22 }
 0x41c   :  { %2865 = vmatpush1.bf16.msra.mxu1 %v4504_v24 }
 0x41d   :  { %2866 = vmatprep.subr.bf16.mxu1 %v4513_v25  ;;  %v4552_v25 = vcombine.low %v1238_v10, %v1242_v11 }
 0x420   :  { %2867 = vmatpush1.bf16.msra.mxu1 %v4512_v34  ;;  %v4561_v34 = vcombine.high %v1246_v21, %v1250_v22 }
 0x421   :  { %2868 = vmatprep.subr.bf16.mxu1 %v4521_v35 }
 0x422   :  { %v2605_v45 = vpop.f32.mrb[12].mxu1  ;;  %v2646_v48 = vpop.f32.mrb[4].mxu0 }
 0x423   :  { %v6327_v59 = vadd.f32 %v2646_v48, %v2605_v45  ;;  %v2607_v60 = vpop.f32.mrb[13].mxu1  ;;  %v2648_v61 = vpop.f32.mrb[5].mxu0 }
 0x424   :  { %v6329_v4 = vadd.f32 %v2648_v61, %v2607_v60  ;;  %2869 = vmatpush1.bf16.msra.mxu1 %v4520_v38  ;;  %v2609_v8 = vpop.f32.mrb[14].mxu1  ;;  %v2650_v9 = vpop.f32.mrb[6].mxu0  ;;  %v1258_v38 = vld [vmem:[%s6949_s9 + $0x6f8] sm:$0xff] }
 0x425   :  { %v2899_v51 = vrot.slane %v6327_v59, 4  ;;  %v2955_v54 = vmul.f32 %v6327_v59, %v6327_v59  ;;  %v2610_v56 = vpop.f32.mrb[15].mxu1  ;;  %v2651_v57 = vpop.f32.mrb[7].mxu0  ;;  %2870 = vmatprep.subr.bf16.mxu1 %v4529_v39  ;;  %v4569_v61 = vcombine.high %v1254_v37, %v1258_v38  ;;  %v1262_v9 = vld [vmem:[%s6949_s9 + $0x718] sm:$0xff] }
 0x426   :  { %v2905_v63 = vrot.slane %v6329_v4, 4  ;;  %v2956_v1 = vmul.f32 %v6329_v4, %v6329_v4  ;;  %v4568_v56 = vcombine.low %v1254_v37, %v1258_v38 }
 0x427   :  { %v2900_v6 = vadd.f32 %v2899_v51, %v6327_v59  ;;  %v2963_v7 = vrot.slane %v2955_v54, 4 }
 0x428   :  { %v2906_v3 = vadd.f32 %v2905_v63, %v6329_v4  ;;  %v2969_v0 = vrot.slane %v2956_v1, 4  ;;  %2871 = vmatpush1.bf16.msra.mxu1 %v4528_v50  ;;  %v1266_v50 = vld [vmem:[%s6949_s9 + $0x738] sm:$0xff] }
 0x429   :  { %v2901_v29 = vrot.slane %v2900_v6, 2  ;;  %v2964_v47 = vadd.f32 %v2963_v7, %v2955_v54  ;;  %2872 = vmatprep.subr.bf16.mxu1 %v4537_v62  ;;  %v4577_v57 = vcombine.high %v1262_v9, %v1266_v50  ;;  %v1270_v62 = vld [vmem:[%s6949_s9 + $0x758] sm:$0xff] }
 0x42a   :  { %v2907_v55 = vrot.slane %v2906_v3, 2  ;;  %v2970_v42 = vadd.f32 %v2969_v0, %v2956_v1  ;;  %v1274_v63 = vld [vmem:[%s6949_s9 + $0x778] sm:$0xff]  ;;  %v4576_v1 = vcombine.low %v1262_v9, %v1266_v50 }
 0x42b   :  { %v2902_v12 = vadd.f32 %v2901_v29, %v2900_v6  ;;  %v2965_v13 = vrot.slane %v2964_v47, 2  ;;  %v4585_v2 = vcombine.high %v1270_v62, %v1274_v63  ;;  %v1282_v6 = vld [vmem:[%s6949_s9 + $0x7b8] sm:$0xff]  ;;  %v4584_v7 = vcombine.low %v1270_v62, %v1274_v63  ;;  %v4896_v63 = vld [vmem:[%s6952_s12] ss:$8 sps:$4 sm:$0xff]  }
 0x42c   :  { %v2908_v14 = vadd.f32 %v2907_v55, %v2906_v3  ;;  %v2971_v15 = vrot.slane %v2970_v42, 2  ;;  %2873 = vmatpush1.bf16.msra.mxu1 %v4536_v27  ;;  %v4593_v3 = vcombine.high %v1278_v5, %v1282_v6  ;;  %v1286_v0 = vld [vmem:[%s6949_s9 + $0x7d8] sm:$0xff] }
 0x42d   :  { %v2903_v28 = vrot.slane %v2902_v12, 1  ;;  %v2966_v17 = vadd.f32 %v2965_v13, %v2964_v47  ;;  %2874 = vmatprep.subr.bf16.mxu1 %v4545_v58  ;;  %v1290_v27 = vld [vmem:[%s6949_s9 + $0x7f8] sm:$0xff]  ;;  %v4592_v58 = vcombine.low %v1278_v5, %v1282_v6 }
 0x42e   :  { %v2909_v19 = vrot.slane %v2908_v14, 1  ;;  %v2972_v20 = vadd.f32 %v2971_v15, %v2970_v42  ;;  %v4601_v42 = vcombine.high %v1286_v0, %v1290_v27  ;;  %v4600_v10 = vcombine.low %v1286_v0, %v1290_v27 }
 0x42f   :  { %v2904_v23 = vadd.f32 %v2903_v28, %v2902_v12  ;;  %v2967_v31 = vrot.slane %v2966_v17, 1 }
 0x430   :  { %v2910_v30 = vadd.f32 %v2909_v19, %v2908_v14  ;;  %v2973_v24 = vrot.slane %v2972_v20, 1  ;;  %2875 = vmatpush1.bf16.msra.mxu1 %v4544_v16 }
 0x431   :  { %v6357_v26 = vmul.f32 0.125, %v2904_v23  ;;  %v2968_v33 = vadd.f32 %v2967_v31, %v2966_v17  ;;  %2876 = vmatprep.subr.bf16.mxu1 %v4553_v18 }
 0x432   :  { %v6359_v35 = vmul.f32 0.125, %v2910_v30  ;;  %v2974_v36 = vadd.f32 %v2973_v24, %v2972_v20 }
 0x433   :  { %v3011_v39 = vmul.f32 0.125, %v2968_v33  ;;  %v3019_v45 = vmul.f32 %v6357_v26, %v6357_v26 }
 0x434   :  { %v3012_v48 = vmul.f32 0.125, %v2974_v36  ;;  %v3020_v41 = vmul.f32 %v6359_v35, %v6359_v35  ;;  %2877 = vmatpush1.bf16.msra.mxu1 %v4552_v25 }
 0x435   :  { %v3027_v60 = vsub.f32 %v3011_v39, %v3019_v45  ;;  %2878 = vmatprep.subr.bf16.mxu1 %v4561_v34 }
 0x436   :  { %v3028_v8 = vsub.f32 %v3012_v48, %v3020_v41 }
 0x437   :  { %v3036_v51 = vadd.f32 0.8, %v3027_v60 }
 0x438   :  { %v3037_v54 = vadd.f32 0.8, %v3028_v8  ;;  %2879 = vmatpush1.bf16.msra.mxu1 %v4560_v49 }
 0x439   :  { %5100 = vrsqrt.f32 %v3036_v51  ;;  %2880 = vmatprep.subr.bf16.mxu1 %v4569_v61  ;;  %v4898_v51 = vld [vmem:[%s6952_s12 + $0x4] ss:$8 sps:$4 sm:$0xff]  }
 0x43a   :  { %5102 = vrsqrt.f32 %v3037_v54  ;;  %4081 = vmatprep.subr.bf16.mxu0 %v4898_v51 }
 0x43b   :  { %4082 = vmatpush1.bf16.msra.mxu0 %v4896_v63  ;;  %v4905_v63 = vld [vmem:[%s6952_s12 + $0x30] ss:$8 sps:$4 sm:$0xff]  }
 0x43c   :  { %2881 = vmatpush1.bf16.msra.mxu1 %v4568_v56 }
 0x43d   :  { %2882 = vmatprep.subr.bf16.mxu1 %v4577_v57 }
 0x440   :  { %2883 = vmatpush1.bf16.msra.mxu1 %v4576_v1 }
 0x441   :  { %2884 = vmatprep.subr.bf16.mxu1 %v4585_v2 }
 0x443   :  { %v6395_v29 = vpop.eup %5100 }
 0x444   :  { %v6397_v47 = vpop.eup %5102  ;;  %2885 = vmatpush1.bf16.msra.mxu1 %v4584_v7 }
 0x445   :  { %v3060_v55 = vcombine.low %v6395_v29, %v6397_v47  ;;  %2886 = vmatprep.subr.bf16.mxu1 %v4593_v3  ;;  %v4920_v29 = vld [vmem:[%s6952_s12 + $0x80] ss:$8 sps:$4 sm:$0xff]   ;;  %v4925_v47 = vld [vmem:[%s6952_s12 + $0x94] ss:$8 sps:$4 sm:$0xff]  }
 0x448   :  { %2887 = vmatpush1.bf16.msra.mxu1 %v4592_v58 }
 0x449   :  { %2888 = vmatprep.subr.bf16.mxu1 %v4601_v42 }
 0x44c   :  { %2889 = vmatpush1.bf16.msra.mxu1 %v4600_v10 }
 0x44f   :  { %2891 = vmatmul.mubr.bf16.vlgmr.msra.gmra.mrb[20].mxu1 %v5800_v32 }
 0x4a2   :  { %v6402_v11 = vpop.f32.mrb[16].mxu1 }
 0x4a3   :  { %v2911_v12 = vrot.slane %v6402_v11, 4  ;;  %v2957_v13 = vmul.f32 %v6402_v11, %v6402_v11  ;;  %v6407_v14 = vpop.f32.mrb[8].mxu0  ;;  %v6409_v15 = vpop.f32.mrb[17].mxu1 }
 0x4a4   :  { %v2923_v16 = vrot.slane %v6407_v14, 4  ;;  %v2959_v28 = vmul.f32 %v6407_v14, %v6407_v14  ;;  %v2917_v17 = vrot.slane %v6409_v15, 4  ;;  %v2958_v32 = vmul.f32 %v6409_v15, %v6409_v15  ;;  %v6417_v18 = vpop.f32.mrb[9].mxu0  ;;  %v2732_v19 = vpop.f32.mrb[18].mxu1 }
 0x4a5   :  { %v2912_v20 = vadd.f32 %v2911_v12, %v6402_v11  ;;  %v2975_v21 = vrot.slane %v2957_v13, 4  ;;  %v2929_v22 = vrot.slane %v6417_v18, 4  ;;  %v2960_v23 = vmul.f32 %v6417_v18, %v6417_v18  ;;  %v2814_v31 = vpop.f32.mrb[10].mxu0  ;;  %v2733_v30 = vpop.f32.mrb[19].mxu1  ;;  %v4899_v19 = vld [vmem:[%s6952_s12 + $0x10] ss:$8 sps:$4 sm:$0xff]  }
 0x4a6   :  { %v2924_v24 = vadd.f32 %v2923_v16, %v6407_v14  ;;  %v2987_v25 = vrot.slane %v2959_v28, 4  ;;  %v2918_v33 = vadd.f32 %v2917_v17, %v6409_v15  ;;  %v2981_v34 = vrot.slane %v2958_v32, 4  ;;  %v2815_v36 = vpop.f32.mrb[11].mxu0 }
 0x4a7   :  { %v2913_v37 = vrot.slane %v2912_v20, 2  ;;  %v2976_v38 = vadd.f32 %v2975_v21, %v2957_v13  ;;  %v2930_v39 = vadd.f32 %v2929_v22, %v6417_v18  ;;  %v2993_v45 = vrot.slane %v2960_v23, 4  ;;  %v4901_v13 = vld [vmem:[%s6952_s12 + $0x14] ss:$8 sps:$4 sm:$0xff]  }
 0x4a8   :  { %v2925_v48 = vrot.slane %v2924_v24, 2  ;;  %v2988_v41 = vadd.f32 %v2987_v25, %v2959_v28  ;;  %v2919_v49 = vrot.slane %v2918_v33, 2  ;;  %v2982_v60 = vadd.f32 %v2981_v34, %v2958_v32  ;;  %4083 = vmatprep.subr.bf16.mxu0 %v4901_v13 }
 0x4a9   :  { %v2914_v61 = vadd.f32 %v2913_v37, %v2912_v20  ;;  %v2977_v8 = vrot.slane %v2976_v38, 2  ;;  %v2931_v9 = vrot.slane %v2930_v39, 2  ;;  %v2994_v50 = vadd.f32 %v2993_v45, %v2960_v23  ;;  %4084 = vmatpush1.bf16.msra.mxu0 %v4899_v19 }
 0x4aa   :  { %v2926_v54 = vadd.f32 %v2925_v48, %v2924_v24  ;;  %v2989_v56 = vrot.slane %v2988_v41, 2  ;;  %v2920_v57 = vadd.f32 %v2919_v49, %v2918_v33  ;;  %v2983_v62 = vrot.slane %v2982_v60, 2  ;;  %v4902_v49 = vld [vmem:[%s6952_s12 + $0x20] ss:$8 sps:$4 sm:$0xff]  }
 0x4ab   :  { %v2915_v1 = vrot.slane %v2914_v61, 1  ;;  %v2978_v2 = vadd.f32 %v2977_v8, %v2976_v38  ;;  %v2932_v5 = vadd.f32 %v2931_v9, %v2930_v39  ;;  %v2995_v6 = vrot.slane %v2994_v50, 2  ;;  %v4904_v38 = vld [vmem:[%s6952_s12 + $0x24] ss:$8 sps:$4 sm:$0xff]  }
 0x4ac   :  { %v2927_v7 = vrot.slane %v2926_v54, 1  ;;  %v2990_v3 = vadd.f32 %v2989_v56, %v2988_v41  ;;  %v2921_v0 = vrot.slane %v2920_v57, 1  ;;  %v2984_v27 = vadd.f32 %v2983_v62, %v2982_v60  ;;  %4085 = vmatprep.subr.bf16.mxu0 %v4904_v38  ;;  %v4907_v56 = vld [vmem:[%s6952_s12 + $0x34] ss:$8 sps:$4 sm:$0xff]   ;;  %v4935_v38 = vld [vmem:[%s6952_s12 + $0xd0] ss:$8 sps:$4 sm:$0xff]  }
 0x4ad   :  { %v2916_v58 = vadd.f32 %v2915_v1, %v2914_v61  ;;  %v2979_v42 = vrot.slane %v2978_v2, 1  ;;  %v2933_v10 = vrot.slane %v2932_v5, 1  ;;  %v2996_v12 = vadd.f32 %v2995_v6, %v2994_v50  ;;  %4086 = vmatpush1.bf16.msra.mxu0 %v4902_v49  ;;  %v4913_v6 = vld [vmem:[%s6952_s12 + $0x54] ss:$8 sps:$4 sm:$0xff]   ;;  %v4946_v49 = vld [vmem:[%s6952_s12 + $0x104] ss:$8 sps:$4 sm:$0xff]  }
 0x4ae   :  { %v2928_v16 = vadd.f32 %v2927_v7, %v2926_v54  ;;  %v2991_v28 = vrot.slane %v2990_v3, 1  ;;  %v2922_v17 = vadd.f32 %v2921_v0, %v2920_v57  ;;  %v2985_v32 = vrot.slane %v2984_v27, 1  ;;  %4087 = vmatprep.subr.bf16.mxu0 %v4907_v56  ;;  %v4911_v7 = vld [vmem:[%s6952_s12 + $0x50] ss:$8 sps:$4 sm:$0xff]   ;;  %v4916_v0 = vld [vmem:[%s6952_s12 + $0x64] ss:$8 sps:$4 sm:$0xff]  }
 0x4af   :  { %v6438_v20 = vmul.f32 0.125, %v2916_v58  ;;  %v2980_v21 = vadd.f32 %v2979_v42, %v2978_v2  ;;  %v2934_v22 = vadd.f32 %v2933_v10, %v2932_v5  ;;  %v2997_v23 = vrot.slane %v2996_v12, 1  ;;  %v4910_v2 = vld [vmem:[%s6952_s12 + $0x44] ss:$8 sps:$4 sm:$0xff]   ;;  %v4908_v5 = vld [vmem:[%s6952_s12 + $0x40] ss:$8 sps:$4 sm:$0xff]  }
 0x4b0   :  { %v6440_v31 = vmul.f32 0.125, %v2928_v16  ;;  %v2992_v30 = vadd.f32 %v2991_v28, %v2990_v3  ;;  %v6442_v24 = vmul.f32 0.125, %v2922_v17  ;;  %v2986_v25 = vadd.f32 %v2985_v32, %v2984_v27  ;;  %v4914_v58 = vld [vmem:[%s6952_s12 + $0x60] ss:$8 sps:$4 sm:$0xff]   ;;  %v4919_v16 = vld [vmem:[%s6952_s12 + $0x74] ss:$8 sps:$4 sm:$0xff]  }
 0x4b1   :  { %v3013_v33 = vmul.f32 0.125, %v2980_v21  ;;  %v3021_v34 = vmul.f32 %v6438_v20, %v6438_v20  ;;  %v6446_v36 = vmul.f32 0.125, %v2934_v22  ;;  %v2998_v37 = vadd.f32 %v2997_v23, %v2996_v12  ;;  %4088 = vmatpush1.bf16.msra.mxu0 %v4905_v63  ;;  %v4917_v32 = vld [vmem:[%s6952_s12 + $0x70] ss:$8 sps:$4 sm:$0xff]   ;;  %v4922_v21 = vld [vmem:[%s6952_s12 + $0x84] ss:$8 sps:$4 sm:$0xff]  }
 0x4b2   :  { %v3015_v39 = vmul.f32 0.125, %v2992_v30  ;;  %v3023_v45 = vmul.f32 %v6440_v31, %v6440_v31  ;;  %v3014_v48 = vmul.f32 0.125, %v2986_v25  ;;  %v3022_v41 = vmul.f32 %v6442_v24, %v6442_v24  ;;  %4089 = vmatprep.subr.bf16.mxu0 %v4910_v2  ;;  %v4928_v22 = vld [vmem:[%s6952_s12 + $0xa4] ss:$8 sps:$4 sm:$0xff]   ;;  %v4926_v23 = vld [vmem:[%s6952_s12 + $0xa0] ss:$8 sps:$4 sm:$0xff]  }
 0x4b3   :  { %v3029_v60 = vsub.f32 %v3013_v33, %v3021_v34  ;;  %v3016_v61 = vmul.f32 0.125, %v2998_v37  ;;  %v3024_v8 = vmul.f32 %v6446_v36, %v6446_v36  ;;  %v6497_v28 = vrot.slane %v3060_v55, %v5386_v46  ;;  %v4923_v55 = vld [vmem:[%s6952_s12 + $0x90] ss:$8 sps:$4 sm:$0xff]   ;;  %v4931_v30 = vld [vmem:[%s6952_s12 + $0xb4] ss:$8 sps:$4 sm:$0xff]  }
 0x4b4   :  { %v3031_v9 = vsub.f32 %v3015_v39, %v3023_v45  ;;  %v3030_v50 = vsub.f32 %v3014_v48, %v3022_v41  ;;  %v4929_v25 = vld [vmem:[%s6952_s12 + $0xb0] ss:$8 sps:$4 sm:$0xff]   ;;  %v4932_v33 = vld [vmem:[%s6952_s12 + $0xc0] ss:$8 sps:$4 sm:$0xff]   ;;  %v4934_v34 = vld [vmem:[%s6952_s12 + $0xc4] ss:$8 sps:$4 sm:$0xff]  }
 0x4b5   :  { %v3038_v51 = vadd.f32 0.8, %v3029_v60  ;;  %v3032_v54 = vsub.f32 %v3016_v61, %v3024_v8  ;;  %4090 = vmatpush1.bf16.msra.mxu0 %v4908_v5  ;;  %v4937_v37 = vld [vmem:[%s6952_s12 + $0xd4] ss:$8 sps:$4 sm:$0xff]   ;;  %v4940_v39 = vld [vmem:[%s6952_s12 + $0xe4] ss:$8 sps:$4 sm:$0xff]  }
 0x4b6   :  { %v3040_v57 = vadd.f32 0.8, %v3031_v9  ;;  %v3039_v62 = vadd.f32 0.8, %v3030_v50  ;;  %4091 = vmatprep.subr.bf16.mxu0 %v4913_v6  ;;  %v4938_v45 = vld [vmem:[%s6952_s12 + $0xe0] ss:$8 sps:$4 sm:$0xff]  }
 0x4b7   :  { %5104 = vrsqrt.f32 %v3038_v51  ;;  %v3041_v1 = vadd.f32 0.8, %v3032_v54  ;;  %v4943_v48 = vld [vmem:[%s6952_s12 + $0xf4] ss:$8 sps:$4 sm:$0xff]   ;;  %v4941_v41 = vld [vmem:[%s6952_s12 + $0xf0] ss:$8 sps:$4 sm:$0xff]  }
 0x4b8   :  { %5106 = vrsqrt.f32 %v3040_v57 }
 0x4b9   :  { %5108 = vrsqrt.f32 %v3039_v62  ;;  %4092 = vmatpush1.bf16.msra.mxu0 %v4911_v7 }
 0x4ba   :  { %5110 = vrsqrt.f32 %v3041_v1  ;;  %4093 = vmatprep.subr.bf16.mxu0 %v4916_v0 }
 0x4bd   :  { %4094 = vmatpush1.bf16.msra.mxu0 %v4914_v58 }
 0x4be   :  { %4095 = vmatprep.subr.bf16.mxu0 %v4919_v16 }
 0x4c1   :  { %v5105_v3 = vpop.eup %5104  ;;  %4096 = vmatpush1.bf16.msra.mxu0 %v4917_v32 }
 0x4c2   :  { %v6481_v27 = vpop.eup %5106  ;;  %4097 = vmatprep.subr.bf16.mxu0 %v4922_v21 }
 0x4c3   :  { %v5109_v42 = vpop.eup %5108 }
 0x4c4   :  { %v6486_v10 = vpop.eup %5110  ;;  %v3061_v12 = vcombine.low %v5105_v3, %v5109_v42 }
 0x4c5   :  { %v3062_v13 = vcombine.low %v6481_v27, %v6486_v10  ;;  %4098 = vmatpush1.bf16.msra.mxu0 %v4920_v29  ;;  %v3135_v27 = vsub.s32 5, %v5383_v44  ;;  %v3139_v10 = vsub.s32 6, %v5383_v44 }
 0x4c6   :  { %v6500_v17 = vrot.slane %v3061_v12, %v5386_v46  ;;  %4099 = vmatprep.subr.bf16.mxu0 %v4925_v47 }
 0x4c8   :  { %v3092_v19 = vcombine.low %v6497_v28, %v6500_v17 }
 0x4c9   :  { %4100 = vmatpush1.bf16.msra.mxu0 %v4923_v55 }
 0x4ca   :  { %4101 = vmatprep.subr.bf16.mxu0 %v4928_v22 }
 0x4cd   :  { %4102 = vmatpush1.bf16.msra.mxu0 %v4926_v23 }
 0x4ce   :  { %4103 = vmatprep.subr.bf16.mxu0 %v4931_v30 }
 0x4d1   :  { %4104 = vmatpush1.bf16.msra.mxu0 %v4929_v25 }
 0x4d2   :  { %4105 = vmatprep.subr.bf16.mxu0 %v4934_v34 }
 0x4d5   :  { %4106 = vmatpush1.bf16.msra.mxu0 %v4932_v33 }
 0x4d6   :  { %4107 = vmatprep.subr.bf16.mxu0 %v4937_v37 }
 0x4d9   :  { %4108 = vmatpush1.bf16.msra.mxu0 %v4935_v38 }
 0x4da   :  { %4109 = vmatprep.subr.bf16.mxu0 %v4940_v39 }
 0x4dd   :  { %4110 = vmatpush1.bf16.msra.mxu0 %v4938_v45 }
 0x4de   :  { %4111 = vmatprep.subr.bf16.mxu0 %v4943_v48 }
 0x4e1   :  { %4112 = vmatpush1.bf16.msra.mxu0 %v4941_v41 }
 0x4e2   :  { %4122 = vmatprep.subr.bf16.mxu0 %v4946_v49 }
 0x522   :  { %v6558_v60 = vpop.f32.mrb[20].mxu1 }
 0x523   :  { %v2935_v61 = vrot.slane %v6558_v60, 4  ;;  %v2961_v8 = vmul.f32 %v6558_v60, %v6558_v60  ;;  %v6563_v9 = vpop.f32.mrb[21].mxu1 }
 0x524   :  { %v2941_v50 = vrot.slane %v6563_v9, 4  ;;  %v2962_v51 = vmul.f32 %v6563_v9, %v6563_v9  ;;  %v2896_v54 = vpop.f32.mrb[22].mxu1 }
 0x525   :  { %v2936_v56 = vadd.f32 %v2935_v61, %v6558_v60  ;;  %v2999_v57 = vrot.slane %v2961_v8, 4  ;;  %v2897_v62 = vpop.f32.mrb[23].mxu1 }
 0x526   :  { %v2942_v63 = vadd.f32 %v2941_v50, %v6563_v9  ;;  %v3005_v1 = vrot.slane %v2962_v51, 4 }
 0x527   :  { %v2937_v2 = vrot.slane %v2936_v56, 2  ;;  %v3000_v5 = vadd.f32 %v2999_v57, %v2961_v8  ;;  %v3100_v57 = vrot.slane %v3092_v19, %v5386_v46 }
 0x528   :  { %v2943_v6 = vrot.slane %v2942_v63, 2  ;;  %v3006_v7 = vadd.f32 %v3005_v1, %v2962_v51  ;;  %v3084_v51 = vrot.slane %v3062_v13, %v5386_v46  ;;  %v3131_v1 = vsub.s32 4, %v5383_v44 }
 0x529   :  { %v2938_v3 = vadd.f32 %v2937_v2, %v2936_v56  ;;  %v3001_v0 = vrot.slane %v3000_v5, 2  ;;  %v3143_v13 = vsub.s32 7, %v5383_v44 }
 0x52a   :  { %v2944_v58 = vadd.f32 %v2943_v6, %v2942_v63  ;;  %v3007_v42 = vrot.slane %v3006_v7, 2  ;;  %v3035_v63 = vld [vmem:[%s6950_s10] sm:$0xff] }
 0x52b   :  { %v2939_v12 = vrot.slane %v2938_v3, 1  ;;  %v3002_v16 = vadd.f32 %v3001_v0, %v3000_v5 }
 0x52c   :  { %v2945_v32 = vrot.slane %v2944_v58, 1  ;;  %v3008_v21 = vadd.f32 %v3007_v42, %v3006_v7 }
 0x52d   :  { %v2940_v29 = vadd.f32 %v2939_v12, %v2938_v3  ;;  %v3003_v47 = vrot.slane %v3002_v16, 1 }
 0x52e   :  { %v2946_v55 = vadd.f32 %v2945_v32, %v2944_v58  ;;  %v3009_v22 = vrot.slane %v3008_v21, 1 }
 0x52f   :  { %v2953_v23 = vmul.f32 0.125, %v2940_v29  ;;  %v3004_v30 = vadd.f32 %v3003_v47, %v3002_v16 }
 0x530   :  { %v2954_v25 = vmul.f32 0.125, %v2946_v55  ;;  %v3010_v33 = vadd.f32 %v3009_v22, %v3008_v21 }
 0x531   :  { %v3017_v34 = vmul.f32 0.125, %v3004_v30  ;;  %v3025_v37 = vmul.f32 %v2953_v23, %v2953_v23 }
 0x532   :  { %v3018_v38 = vmul.f32 0.125, %v3010_v33  ;;  %v3026_v39 = vmul.f32 %v2954_v25, %v2954_v25 }
 0x533   :  { %v3033_v45 = vsub.f32 %v3017_v34, %v3025_v37 }
 0x534   :  { %v3034_v48 = vsub.f32 %v3018_v38, %v3026_v39  ;;  %v3111_v39 = vld [vmem:[%s6951_s11] sm:$0xff] }
 0x535   :  { %v3042_v41 = vadd.f32 0.8, %v3033_v45 }
 0x536   :  { %v3043_v49 = vadd.f32 0.8, %v3034_v48 }
 0x537   :  { %5112 = vrsqrt.f32 %v3042_v41 }
 0x538   :  { %5114 = vrsqrt.f32 %v3043_v49 }
 0x541   :  { %v5113_v61 = vpop.eup %5112 }
 0x542   :  { %v5115_v8 = vpop.eup %5114 }
 0x543   :  { %v3063_v50 = vcombine.low %v5113_v61, %v5115_v8 }
 0x545   :  { %v3091_v54 = vrot.slane %v3063_v50, %v5386_v46 }
 0x547   :  { %v3093_v56 = vcombine.low %v3084_v51, %v3091_v54 }
 0x549   :  { %v3107_v62 = vrot.slane %v3093_v56, %v5386_v46 }
 0x54b   :  { %v3108_v2 = vcombine.low %v3100_v57, %v3107_v62 }
 0x54d   :  { %v3110_v5 = vmul.f32 %v3108_v2, %v3035_v63 }
 0x54f   :  { %v3132_v6 = vrot.slane %v3110_v5, %v3131_v1  ;;  %v3136_v7 = vrot.slane %v3110_v5, %v3135_v27  ;;  %v3140_v28 = vrot.slane %v3110_v5, %v3139_v10  ;;  %v3144_v17 = vrot.slane %v3110_v5, %v3143_v13 }
 0x550   :  { %v3116_v19 = vrot.slane %v3110_v5, %v5394_v52  ;;  %v3120_v3 = vrot.slane %v3110_v5, %v5397_v53  ;;  %v3124_v0 = vrot.slane %v3110_v5, %v5758_v40  ;;  %v3128_v58 = vrot.slane %v3110_v5, %v5761_v43 }
 0x551   :  { %v3157_v42 = vmul.f32 %v3132_v6, %v6440_v31  ;;  %v3158_v12 = vmul.f32 %v3136_v7, %v6446_v36  ;;  %v3159_v16 = vmul.f32 %v3140_v28, %v2953_v23  ;;  %v3160_v32 = vmul.f32 %v3144_v17, %v2954_v25 }
 0x552   :  { %v3227_v44 = vmul.f32 %v3144_v17, %v6563_v9  ;;  %v3153_v21 = vmul.f32 %v3116_v19, %v6357_v26  ;;  %v3154_v29 = vmul.f32 %v3120_v3, %v6359_v35  ;;  %v3155_v47 = vmul.f32 %v3124_v0, %v6438_v20 }
 0x553   :  { %v3171_v55 = vcombine.low %v3157_v42, %v3158_v12  ;;  %v3172_v22 = vcombine.low %v3159_v16, %v3160_v32  ;;  %v3156_v30 = vmul.f32 %v3128_v58, %v6442_v24  ;;  %v3221_v33 = vmul.f32 %v3120_v3, %v6329_v4  ;;  %v4952_v3 = vld [vmem:[%s6952_s12 + $0x124] ss:$8 sps:$4 sm:$0xff]   ;;  %v4953_v42 = vld [vmem:[%s6952_s12 + $0x130] ss:$8 sps:$4 sm:$0xff]   ;;  %v4956_v16 = vld [vmem:[%s6952_s12 + $0x140] ss:$8 sps:$4 sm:$0xff]  }
 0x554   :  { %v3169_v34 = vcombine.low %v3153_v21, %v3154_v29  ;;  %v3220_v31 = vmul.f32 %v3116_v19, %v6327_v59  ;;  %v3223_v36 = vmul.f32 %v3128_v58, %v6409_v15  ;;  %v3222_v23 = vmul.f32 %v3124_v0, %v6402_v11  ;;  %v4947_v19 = vld [vmem:[%s6952_s12 + $0x110] ss:$8 sps:$4 sm:$0xff]   ;;  %v4950_v0 = vld [vmem:[%s6952_s12 + $0x120] ss:$8 sps:$4 sm:$0xff]   ;;  %v4955_v58 = vld [vmem:[%s6952_s12 + $0x134] ss:$8 sps:$4 sm:$0xff]  }
 0x555   :  { %v3193_v9 = vrot.slane %v3171_v55, %v5386_v46  ;;  %v3200_v26 = vrot.slane %v3172_v22, %v5386_v46  ;;  %v3170_v35 = vcombine.low %v3155_v47, %v3156_v30  ;;  %v3225_v20 = vmul.f32 %v3136_v7, %v6417_v18  ;;  %v4958_v12 = vld [vmem:[%s6952_s12 + $0x144] ss:$8 sps:$4 sm:$0xff]   ;;  %v4961_v32 = vld [vmem:[%s6952_s12 + $0x154] ss:$8 sps:$4 sm:$0xff]   ;;  %v4962_v29 = vld [vmem:[%s6952_s12 + $0x160] ss:$8 sps:$4 sm:$0xff]  }
 0x556   :  { %v3179_v25 = vrot.slane %v3169_v34, %v5386_v46  ;;  %v3224_v24 = vmul.f32 %v3132_v6, %v6407_v14  ;;  %v3226_v4 = vmul.f32 %v3140_v28, %v6558_v60  ;;  %v4944_v6 = vld [vmem:[%s6952_s12 + $0x100] ss:$8 sps:$4 sm:$0xff]   ;;  %v4949_v28 = vld [vmem:[%s6952_s12 + $0x114] ss:$8 sps:$4 sm:$0xff]   ;;  %v4964_v21 = vld [vmem:[%s6952_s12 + $0x164] ss:$8 sps:$4 sm:$0xff]  }
 0x557   :  { %v3202_v37 = vcombine.low %v3193_v9, %v3200_v26  ;;  %v3186_v59 = vrot.slane %v3170_v35, %v5386_v46  ;;  %v4967_v47 = vld [vmem:[%s6952_s12 + $0x174] ss:$8 sps:$4 sm:$0xff]   ;;  %v4965_v55 = vld [vmem:[%s6952_s12 + $0x170] ss:$8 sps:$4 sm:$0xff]   ;;  %v4970_v22 = vld [vmem:[%s6952_s12 + $0x184] ss:$8 sps:$4 sm:$0xff]  }
 0x558   :  { %v4968_v30 = vld [vmem:[%s6952_s12 + $0x180] ss:$8 sps:$4 sm:$0xff]   ;;  %v4971_v34 = vld [vmem:[%s6952_s12 + $0x190] ss:$8 sps:$4 sm:$0xff]   ;;  %v4982_v26 = vld [vmem:[%s6952_s12 + $0x1c4] ss:$8 sps:$4 sm:$0xff]  }
 0x559   :  { %v3216_v15 = vrot.slane %v3202_v37, %v5386_v46  ;;  %v3201_v38 = vcombine.low %v3179_v25, %v3186_v59  ;;  %v4977_v9 = vld [vmem:[%s6952_s12 + $0x1b0] ss:$8 sps:$4 sm:$0xff]   ;;  %v4980_v35 = vld [vmem:[%s6952_s12 + $0x1c0] ss:$8 sps:$4 sm:$0xff]   ;;  %v4991_v37 = vld [vmem:[%s6952_s12 + $0x1f4] ss:$8 sps:$4 sm:$0xff]  }
 0x55a   :  { %v4983_v25 = vld [vmem:[%s6952_s12 + $0x1d0] ss:$8 sps:$4 sm:$0xff]  }
 0x55b   :  { %v3209_v11 = vrot.slane %v3201_v38, %v5386_v46  ;;  %v4989_v38 = vld [vmem:[%s6952_s12 + $0x1f0] ss:$8 sps:$4 sm:$0xff]  }
 0x55d   :  { %v3217_v45 = vcombine.low %v3209_v11, %v3216_v15 }
 0x55f   :  { %v3219_v18 = vsub.f32 %v3111_v39, %v3217_v45  ;;  %v4994_v39 = vld [vmem:[%s6952_s12 + $0x204] ss:$8 sps:$4 sm:$0xff]  }
 0x561   :  { %v3236_v48 = vrot.slane %v3219_v18, %v5397_v53  ;;  %v3232_v14 = vrot.slane %v3219_v18, %v5394_v52  ;;  %v3244_v60 = vrot.slane %v3219_v18, %v5761_v43  ;;  %v3240_v41 = vrot.slane %v3219_v18, %v5758_v40 }
 0x562   :  { %v3252_v49 = vrot.slane %v3219_v18, %v3135_v27  ;;  %v3248_v61 = vrot.slane %v3219_v18, %v3131_v1  ;;  %v3260_v8 = vrot.slane %v3219_v18, %v3143_v13  ;;  %v3256_v50 = vrot.slane %v3219_v18, %v3139_v10  ;;  %v4992_v18 = vld [vmem:[%s6952_s12 + $0x200] ss:$8 sps:$4 sm:$0xff]  }
 0x563   :  { %v3270_v51 = vadd.f32 %v3236_v48, %v3221_v33  ;;  %v3269_v46 = vadd.f32 %v3232_v14, %v3220_v31  ;;  %v3272_v54 = vadd.f32 %v3244_v60, %v3223_v36  ;;  %v6618_v56 = vadd.f32 %v3240_v41, %v3222_v23  ;;  %v4973_v33 = vld [vmem:[%s6952_s12 + $0x194] ss:$8 sps:$4 sm:$0xff]   ;;  %v4976_v31 = vld [vmem:[%s6952_s12 + $0x1a4] ss:$8 sps:$4 sm:$0xff]   ;;  %v4974_v36 = vld [vmem:[%s6952_s12 + $0x1a0] ss:$8 sps:$4 sm:$0xff]  }
 0x564   :  { %v6620_v57 = vadd.f32 %v3252_v49, %v3225_v20  ;;  %v6622_v62 = vadd.f32 %v3248_v61, %v3224_v24  ;;  %v6624_v63 = vadd.f32 %v3260_v8, %v3227_v44  ;;  %v6626_v2 = vadd.f32 %v3256_v50, %v3226_v4  ;;  %v4959_v44 = vld [vmem:[%s6952_s12 + $0x150] ss:$8 sps:$4 sm:$0xff]   ;;  %v4979_v23 = vld [vmem:[%s6952_s12 + $0x1b4] ss:$8 sps:$4 sm:$0xff]   ;;  %v4988_v24 = vld [vmem:[%s6952_s12 + $0x1e4] ss:$8 sps:$4 sm:$0xff]  }
 0x565   :  { %v3278_v43 = vmul.f32 0.2, %v3270_v51  ;;  %v3277_v5 = vmul.f32 0.2, %v3269_v46  ;;  %v3280_v40 = vmul.f32 0.2, %v3272_v54 }
 0x566   :  { %v4985_v20 = vld [vmem:[%s6952_s12 + $0x1d4] ss:$8 sps:$4 sm:$0xff]   ;;  %v4986_v4 = vld [vmem:[%s6952_s12 + $0x1e0] ss:$8 sps:$4 sm:$0xff]   ;;  %v3279_v59 = vmul.f32 0.2, %v6618_v56 }
 0x567   :  { %v3286_v27 = vmax.f32 %v3270_v51, %v3278_v43  ;;  %v3285_v1 = vmax.f32 %v3269_v46, %v3277_v5  ;;  %v3288_v13 = vmax.f32 %v3272_v54, %v3280_v40  ;;  %v3282_v15 = vmul.f32 0.2, %v6620_v57  ;;  %v4997_v14 = vld [vmem:[%s6952_s12 + $0x214] ss:$8 sps:$4 sm:$0xff]   ;;  %v4995_v41 = vld [vmem:[%s6952_s12 + $0x210] ss:$8 sps:$4 sm:$0xff]  }
 0x568   :  { %v3287_v11 = vmax.f32 %v6618_v56, %v3279_v59  ;;  %v5000_v49 = vld [vmem:[%s6952_s12 + $0x224] ss:$8 sps:$4 sm:$0xff]   ;;  %v4998_v61 = vld [vmem:[%s6952_s12 + $0x220] ss:$8 sps:$4 sm:$0xff]   ;;  %v5003_v8 = vld [vmem:[%s6952_s12 + $0x234] ss:$8 sps:$4 sm:$0xff]  }
 0x569   :  { %v3294_v10 = vpack.c.bf16 %v3286_v27, %v3286_v27  ;;  %v3293_v7 = vpack.c.bf16 %v3285_v1, %v3285_v1  ;;  %v3296_v17 = vpack.c.bf16 %v3288_v13, %v3288_v13  ;;  %v3290_v45 = vmax.f32 %v6620_v57, %v3282_v15  ;;  %v5001_v50 = vld [vmem:[%s6952_s12 + $0x230] ss:$8 sps:$4 sm:$0xff]   ;;  %v5006_v51 = vld [vmem:[%s6952_s12 + $0x244] ss:$8 sps:$4 sm:$0xff]   ;;  %v5004_v46 = vld [vmem:[%s6952_s12 + $0x240] ss:$8 sps:$4 sm:$0xff]  }
 0x56a   :  { %v3295_v48 = vpack.c.bf16 %v3287_v11, %v3287_v11  ;;  %v5009_v54 = vld [vmem:[%s6952_s12 + $0x254] ss:$8 sps:$4 sm:$0xff]   ;;  %v5007_v56 = vld [vmem:[%s6952_s12 + $0x250] ss:$8 sps:$4 sm:$0xff]   ;;  %v5012_v57 = vld [vmem:[%s6952_s12 + $0x264] ss:$8 sps:$4 sm:$0xff]  }
 0x56b   :  { %4113 = vmatprep.mubr.bf16.mxu0 %v3294_v10  ;;  %v3298_v60 = vpack.c.bf16 %v3290_v45, %v3290_v45  ;;  %v5010_v43 = vld [vmem:[%s6952_s12 + $0x260] ss:$8 sps:$4 sm:$0xff]   ;;  %v5015_v5 = vld [vmem:[%s6952_s12 + $0x274] ss:$8 sps:$4 sm:$0xff]   ;;  %v5013_v40 = vld [vmem:[%s6952_s12 + $0x270] ss:$8 sps:$4 sm:$0xff]  }
 0x56c   :  { %4114 = vmatmul.mubr.bf16.vlgmr.msra.gmra.mrb[12].mxu0 %v3293_v7  ;;  %v5018_v27 = vld [vmem:[%s6952_s12 + $0x284] ss:$8 sps:$4 sm:$0xff]   ;;  %v5016_v1 = vld [vmem:[%s6952_s12 + $0x280] ss:$8 sps:$4 sm:$0xff]   ;;  %v5021_v13 = vld [vmem:[%s6952_s12 + $0x294] ss:$8 sps:$4 sm:$0xff]  }
 0x56d   :  { %4123 = vmatpush1.bf16.msra.mxu0 %v4944_v6  ;;  %4154 = vmatprep.mubr.bf16.mxu0 %v3296_v17  ;;  %v5019_v10 = vld [vmem:[%s6952_s12 + $0x290] ss:$8 sps:$4 sm:$0xff]   ;;  %v5024_v6 = vld [vmem:[%s6952_s12 + $0x2a4] ss:$8 sps:$4 sm:$0xff]   ;;  %v5022_v7 = vld [vmem:[%s6952_s12 + $0x2a0] ss:$8 sps:$4 sm:$0xff]  }
 0x56e   :  { %4124 = vmatprep.subr.bf16.mxu0 %v4949_v28  ;;  %v5027_v28 = vld [vmem:[%s6952_s12 + $0x2b4] ss:$8 sps:$4 sm:$0xff]   ;;  %v5025_v17 = vld [vmem:[%s6952_s12 + $0x2b0] ss:$8 sps:$4 sm:$0xff]   ;;  %v5066_v59 = vld [vmem:[%s6952_s12 + $0x384] ss:$8 sps:$4 sm:$0xff]  }
 0x56f   :  { %v5064_v15 = vld [vmem:[%s6952_s12 + $0x380] ss:$8 sps:$4 sm:$0xff]   ;;  %v5067_v11 = vld [vmem:[%s6952_s12 + $0x390] ss:$8 sps:$4 sm:$0xff]  }
 0x570   :  { %v5070_v45 = vld [vmem:[%s6952_s12 + $0x3a0] ss:$8 sps:$4 sm:$0xff]  }
 0x571   :  { %4125 = vmatpush1.bf16.msra.mxu0 %v4947_v19  ;;  %v5030_v19 = vld [vmem:[%s6952_s12 + $0x2c4] ss:$8 sps:$4 sm:$0xff]  }
 0x572   :  { %4126 = vmatprep.subr.bf16.mxu0 %v4952_v3  ;;  %v5028_v3 = vld [vmem:[%s6952_s12 + $0x2c0] ss:$8 sps:$4 sm:$0xff]  }
 0x575   :  { %4127 = vmatpush1.bf16.msra.mxu0 %v4950_v0  ;;  %v5033_v0 = vld [vmem:[%s6952_s12 + $0x2d4] ss:$8 sps:$4 sm:$0xff]  }
 0x576   :  { %4128 = vmatprep.subr.bf16.mxu0 %v4955_v58  ;;  %v5031_v58 = vld [vmem:[%s6952_s12 + $0x2d0] ss:$8 sps:$4 sm:$0xff]  }
 0x579   :  { %4129 = vmatpush1.bf16.msra.mxu0 %v4953_v42  ;;  %v5036_v42 = vld [vmem:[%s6952_s12 + $0x2e4] ss:$8 sps:$4 sm:$0xff]  }
 0x57a   :  { %4130 = vmatprep.subr.bf16.mxu0 %v4958_v12  ;;  %v5034_v12 = vld [vmem:[%s6952_s12 + $0x2e0] ss:$8 sps:$4 sm:$0xff]  }
 0x57d   :  { %4131 = vmatpush1.bf16.msra.mxu0 %v4956_v16  ;;  %v5039_v16 = vld [vmem:[%s6952_s12 + $0x2f4] ss:$8 sps:$4 sm:$0xff]  }
 0x57e   :  { %4132 = vmatprep.subr.bf16.mxu0 %v4961_v32  ;;  %v3281_v32 = vmul.f32 0.2, %v6622_v62 }
 0x581   :  { %4133 = vmatpush1.bf16.msra.mxu0 %v4959_v44  ;;  %v3284_v44 = vmul.f32 0.2, %v6624_v63 }
 0x582   :  { %4134 = vmatprep.subr.bf16.mxu0 %v4964_v21  ;;  %v5037_v21 = vld [vmem:[%s6952_s12 + $0x2f0] ss:$8 sps:$4 sm:$0xff]  }
 0x585   :  { %4135 = vmatpush1.bf16.msra.mxu0 %v4962_v29  ;;  %v3289_v29 = vmax.f32 %v6622_v62, %v3281_v32  ;;  %v5043_v62 = vld [vmem:[%s6952_s12 + $0x310] ss:$8 sps:$4 sm:$0xff]  }
 0x586   :  { %4136 = vmatprep.subr.bf16.mxu0 %v4967_v47  ;;  %v5042_v47 = vld [vmem:[%s6952_s12 + $0x304] ss:$8 sps:$4 sm:$0xff]  }
 0x589   :  { %4137 = vmatpush1.bf16.msra.mxu0 %v4965_v55  ;;  %v3292_v55 = vmax.f32 %v6624_v63, %v3284_v44  ;;  %v5048_v63 = vld [vmem:[%s6952_s12 + $0x324] ss:$8 sps:$4 sm:$0xff]  }
 0x58a   :  { %4138 = vmatprep.subr.bf16.mxu0 %v4970_v22  ;;  %v5040_v22 = vld [vmem:[%s6952_s12 + $0x300] ss:$8 sps:$4 sm:$0xff]  }
 0x58d   :  { %4139 = vmatpush1.bf16.msra.mxu0 %v4968_v30  ;;  %v3297_v30 = vpack.c.bf16 %v3289_v29, %v3289_v29 }
 0x58e   :  { %4140 = vmatprep.subr.bf16.mxu0 %v4973_v33  ;;  %v5045_v33 = vld [vmem:[%s6952_s12 + $0x314] ss:$8 sps:$4 sm:$0xff]  }
 0x591   :  { %4141 = vmatpush1.bf16.msra.mxu0 %v4971_v34  ;;  %v3300_v34 = vpack.c.bf16 %v3292_v55, %v3292_v55 }
 0x592   :  { %4142 = vmatprep.subr.bf16.mxu0 %v4976_v31  ;;  %v5046_v31 = vld [vmem:[%s6952_s12 + $0x320] ss:$8 sps:$4 sm:$0xff]  }
 0x595   :  { %4143 = vmatpush1.bf16.msra.mxu0 %v4974_v36  ;;  %v5051_v36 = vld [vmem:[%s6952_s12 + $0x334] ss:$8 sps:$4 sm:$0xff]  }
 0x596   :  { %4144 = vmatprep.subr.bf16.mxu0 %v4979_v23  ;;  %v5049_v23 = vld [vmem:[%s6952_s12 + $0x330] ss:$8 sps:$4 sm:$0xff]  }
 0x599   :  { %4145 = vmatpush1.bf16.msra.mxu0 %v4977_v9  ;;  %v5054_v9 = vld [vmem:[%s6952_s12 + $0x344] ss:$8 sps:$4 sm:$0xff]  }
 0x59a   :  { %4146 = vmatprep.subr.bf16.mxu0 %v4982_v26  ;;  %v5052_v26 = vld [vmem:[%s6952_s12 + $0x340] ss:$8 sps:$4 sm:$0xff]  }
 0x59d   :  { %4147 = vmatpush1.bf16.msra.mxu0 %v4980_v35  ;;  %v5057_v35 = vld [vmem:[%s6952_s12 + $0x354] ss:$8 sps:$4 sm:$0xff]  }
 0x59e   :  { %4148 = vmatprep.subr.bf16.mxu0 %v4985_v20  ;;  %v5055_v20 = vld [vmem:[%s6952_s12 + $0x350] ss:$8 sps:$4 sm:$0xff]  }
 0x5a1   :  { %4149 = vmatpush1.bf16.msra.mxu0 %v4983_v25  ;;  %v5060_v25 = vld [vmem:[%s6952_s12 + $0x364] ss:$8 sps:$4 sm:$0xff]  }
 0x5a2   :  { %4150 = vmatprep.subr.bf16.mxu0 %v4988_v24  ;;  %v5058_v24 = vld [vmem:[%s6952_s12 + $0x360] ss:$8 sps:$4 sm:$0xff]  }
 0x5a5   :  { %4151 = vmatpush1.bf16.msra.mxu0 %v4986_v4  ;;  %v5063_v4 = vld [vmem:[%s6952_s12 + $0x374] ss:$8 sps:$4 sm:$0xff]  }
 0x5a6   :  { %4152 = vmatprep.subr.bf16.mxu0 %v4991_v37  ;;  %v5061_v37 = vld [vmem:[%s6952_s12 + $0x370] ss:$8 sps:$4 sm:$0xff]  }
 0x5a9   :  { %4153 = vmatpush1.bf16.msra.mxu0 %v4989_v38  ;;  %v5069_v38 = vld [vmem:[%s6952_s12 + $0x394] ss:$8 sps:$4 sm:$0xff]  }
 0x5aa   :  { %4163 = vmatprep.subr.bf16.mxu0 %v4994_v39  ;;  %v5072_v39 = vld [vmem:[%s6952_s12 + $0x3a4] ss:$8 sps:$4 sm:$0xff]  }
 0x5ac   :  { %4155 = vmatmul.mubr.bf16.vlgmr.msra.gmra.mrb[12].mxu0 %v3295_v48  ;;  %v5073_v48 = vld [vmem:[%s6952_s12 + $0x3b0] ss:$8 sps:$4 sm:$0xff]  }
 0x5ad   :  { %4164 = vmatpush1.bf16.msra.mxu0 %v4992_v18  ;;  %4195 = vmatprep.mubr.bf16.mxu0 %v3298_v60  ;;  %v5075_v18 = vld [vmem:[%s6952_s12 + $0x3b4] ss:$8 sps:$4 sm:$0xff]   ;;  %v5076_v60 = vld [vmem:[%s6952_s12 + $0x3c0] ss:$8 sps:$4 sm:$0xff]  }
 0x5ae   :  { %4165 = vmatprep.subr.bf16.mxu0 %v4997_v14  ;;  %v5078_v14 = vld [vmem:[%s6952_s12 + $0x3c4] ss:$8 sps:$4 sm:$0xff]  }
 0x5b1   :  { %4166 = vmatpush1.bf16.msra.mxu0 %v4995_v41  ;;  %v5081_v41 = vld [vmem:[%s6952_s12 + $0x3d4] ss:$8 sps:$4 sm:$0xff]  }
 0x5b2   :  { %4167 = vmatprep.subr.bf16.mxu0 %v5000_v49  ;;  %v5079_v49 = vld [vmem:[%s6952_s12 + $0x3d0] ss:$8 sps:$4 sm:$0xff]  }
 0x5b5   :  { %4168 = vmatpush1.bf16.msra.mxu0 %v4998_v61  ;;  %v5084_v61 = vld [vmem:[%s6952_s12 + $0x3e4] ss:$8 sps:$4 sm:$0xff]  }
 0x5b6   :  { %4169 = vmatprep.subr.bf16.mxu0 %v5003_v8  ;;  %v5082_v8 = vld [vmem:[%s6952_s12 + $0x3e0] ss:$8 sps:$4 sm:$0xff]  }
 0x5b9   :  { %4170 = vmatpush1.bf16.msra.mxu0 %v5001_v50  ;;  %v5087_v50 = vld [vmem:[%s6952_s12 + $0x3f4] ss:$8 sps:$4 sm:$0xff]  }
 0x5ba   :  { %4171 = vmatprep.subr.bf16.mxu0 %v5006_v51  ;;  %v3283_v51 = vmul.f32 0.2, %v6626_v2 }
 0x5bd   :  { %4172 = vmatpush1.bf16.msra.mxu0 %v5004_v46  ;;  %v5085_v46 = vld [vmem:[%s6952_s12 + $0x3f0] ss:$8 sps:$4 sm:$0xff]   ;;  %s5148_s12 = smov [#allocation2]  }
 0x5be   :  { %4173 = vmatprep.subr.bf16.mxu0 %v5009_v54  ;;  %v3291_v54 = vmax.f32 %v6626_v2, %v3283_v51  ;;  %s4255_s30 = sshll.u32 %s5148_s12, 4  ;;  %s4256_s30 = int_to_ptr.vmem [resolvable:$true] %s4255_s30 }
 0x5bf   :  { %p5125_p1 = scmp.lt.s32.totalorder %s4256_s30, %s4256_s30 }
 0x5c1   :  { %4174 = vmatpush1.bf16.msra.mxu0 %v5007_v56  ;;  %v3299_v56 = vpack.c.bf16 %v3291_v54, %v3291_v54 }
 0x5c2   :  { %4175 = vmatprep.subr.bf16.mxu0 %v5012_v57  ;;  %v3429_v57 = vld [vmem:[%s6953_s13] sm:$0x3]  ;;  %s5120_s13 = scalar_lea.vmem %s4256_s30, 256 }
 0x5c3   :  { %p5121_p0 = scmp.ne.s32.totalorder %s4256_s30, %s5120_s13  ;;  %p5126_p2 = scmp.lt.s32.totalorder %s5120_s13, %s5120_s13 }
 0x5c5   :  { %4176 = vmatpush1.bf16.msra.mxu0 %v5010_v43  ;;  %v3434_v43 = vrot.slane %v3429_v57, %v5394_v52  ;;  %p5127_p3 = por %p5126_p2, %p5125_p1 }
 0x5c6   :  { %4177 = vmatprep.subr.bf16.mxu0 %v5015_v5  ;;  %v3438_v5 = vrot.slane %v3429_v57, %v5397_v53 }
 0x5c7   :  { %p5128_p4 = pnand %p5127_p3, %p5121_p0 }
 0x5c9   :  { %4178 = vmatpush1.bf16.msra.mxu0 %v5013_v40 }
 0x5ca   :  { %4179 = vmatprep.subr.bf16.mxu0 %v5018_v27 }
 0x5cd   :  { %4180 = vmatpush1.bf16.msra.mxu0 %v5016_v1 }
 0x5ce   :  { %4181 = vmatprep.subr.bf16.mxu0 %v5021_v13 }
 0x5d1   :  { %4182 = vmatpush1.bf16.msra.mxu0 %v5019_v10 }
 0x5d2   :  { %4183 = vmatprep.subr.bf16.mxu0 %v5024_v6 }
 0x5d5   :  { %4184 = vmatpush1.bf16.msra.mxu0 %v5022_v7 }
 0x5d6   :  { %4185 = vmatprep.subr.bf16.mxu0 %v5027_v28 }
 0x5d9   :  { %4186 = vmatpush1.bf16.msra.mxu0 %v5025_v17 }
 0x5da   :  { %4187 = vmatprep.subr.bf16.mxu0 %v5030_v19 }
 0x5dd   :  { %4188 = vmatpush1.bf16.msra.mxu0 %v5028_v3 }
 0x5de   :  { %4189 = vmatprep.subr.bf16.mxu0 %v5033_v0 }
 0x5e1   :  { %4190 = vmatpush1.bf16.msra.mxu0 %v5031_v58 }
 0x5e2   :  { %4191 = vmatprep.subr.bf16.mxu0 %v5036_v42 }
 0x5e5   :  { %4192 = vmatpush1.bf16.msra.mxu0 %v5034_v12 }
 0x5e6   :  { %4193 = vmatprep.subr.bf16.mxu0 %v5039_v16 }
 0x5e9   :  { %4194 = vmatpush1.bf16.msra.mxu0 %v5037_v21 }
 0x5ea   :  { %4204 = vmatprep.subr.bf16.mxu0 %v5042_v47 }
 0x5ec   :  { %4196 = vmatmul.mubr.bf16.vlgmr.msra.gmra.mrb[12].mxu0 %v3297_v30 }
 0x5ed   :  { %4205 = vmatpush1.bf16.msra.mxu0 %v5040_v22  ;;  %4236 = vmatprep.mubr.bf16.mxu0 %v3300_v34 }
 0x5ee   :  { %4206 = vmatprep.subr.bf16.mxu0 %v5045_v33 }
 0x5f1   :  { %4207 = vmatpush1.bf16.msra.mxu0 %v5043_v62 }
 0x5f2   :  { %4208 = vmatprep.subr.bf16.mxu0 %v5048_v63 }
 0x5f5   :  { %4209 = vmatpush1.bf16.msra.mxu0 %v5046_v31 }
 0x5f6   :  { %4210 = vmatprep.subr.bf16.mxu0 %v5051_v36 }
 0x5f9   :  { %4211 = vmatpush1.bf16.msra.mxu0 %v5049_v23 }
 0x5fa   :  { %4212 = vmatprep.subr.bf16.mxu0 %v5054_v9 }
 0x5fd   :  { %4213 = vmatpush1.bf16.msra.mxu0 %v5052_v26 }
 0x5fe   :  { %4214 = vmatprep.subr.bf16.mxu0 %v5057_v35 }
 0x601   :  { %4215 = vmatpush1.bf16.msra.mxu0 %v5055_v20 }
 0x602   :  { %4216 = vmatprep.subr.bf16.mxu0 %v5060_v25 }
 0x605   :  { %4217 = vmatpush1.bf16.msra.mxu0 %v5058_v24 }
 0x606   :  { %4218 = vmatprep.subr.bf16.mxu0 %v5063_v4 }
 0x609   :  { %4219 = vmatpush1.bf16.msra.mxu0 %v5061_v37 }
 0x60a   :  { %4220 = vmatprep.subr.bf16.mxu0 %v5066_v59 }
 0x60d   :  { %4221 = vmatpush1.bf16.msra.mxu0 %v5064_v15 }
 0x60e   :  { %4222 = vmatprep.subr.bf16.mxu0 %v5069_v38 }
 0x611   :  { %4223 = vmatpush1.bf16.msra.mxu0 %v5067_v11 }
 0x612   :  { %4224 = vmatprep.subr.bf16.mxu0 %v5072_v39 }
 0x615   :  { %4225 = vmatpush1.bf16.msra.mxu0 %v5070_v45 }
 0x616   :  { %4226 = vmatprep.subr.bf16.mxu0 %v5075_v18 }
 0x619   :  { %4227 = vmatpush1.bf16.msra.mxu0 %v5073_v48 }
 0x61a   :  { %4228 = vmatprep.subr.bf16.mxu0 %v5078_v14 }
 0x61d   :  { %4229 = vmatpush1.bf16.msra.mxu0 %v5076_v60 }
 0x61e   :  { %4230 = vmatprep.subr.bf16.mxu0 %v5081_v41 }
 0x621   :  { %4231 = vmatpush1.bf16.msra.mxu0 %v5079_v49 }
 0x622   :  { %4232 = vmatprep.subr.bf16.mxu0 %v5084_v61 }
 0x625   :  { %4233 = vmatpush1.bf16.msra.mxu0 %v5082_v8 }
 0x626   :  { %4234 = vmatprep.subr.bf16.mxu0 %v5087_v50 }
 0x629   :  { %4235 = vmatpush1.bf16.msra.mxu0 %v5085_v46 }
 0x62c   :  { %4237 = vmatmul.mubr.bf16.vlgmr.msra.gmra.mrb[12].mxu0 %v3299_v56 }
 0x6ff   :  { %v4238_v40 = vpop.f32.mrb[12].mxu0 }
 0x700   :  { %v4743_v27 = vadd.f32 %v4238_v40, %v3434_v43  ;;  %v4240_v1 = vpop.f32.mrb[13].mxu0 }
 0x701   :  { %v4744_v13 = vadd.f32 %v4240_v1, %v3438_v5  ;;  %v4242_v10 = vpop.f32.mrb[14].mxu0 }
 0x702   :  { %5116 = vtanh.f32 %v4743_v27  ;;  %v4243_v6 = vpop.f32.mrb[15].mxu0 }
 0x703   :  { %5118 = vtanh.f32 %v4744_v13 }
 0x70c   :  { %v5117_v2 = vpop.eup %5116 }
 0x70d   :  { %v5119_v7 = vpop.eup %5118  ;;  %4247 = vst [vmem:[#allocation2] sm:$0xff] %v5117_v2 }
 0x70e   :  { %4248 = vst [vmem:[#allocation2 + $0x8] sm:$0xff] %v5119_v7 }
 0x70f   :  { %5131 = shalt.err (!%p5128_p4)
}
 0x710   :  { %s5132_s16 = scalar_lea.hbm %s6954_s14, 256 }
 0x711   :  { %p5133_p5 = scmp.ne.s32.totalorder %s6954_s14, %s5132_s16  ;;  %p5136_p6 = scmp.lt.u32.totalorder %s5132_s16, %s6954_s14 }
 0x713   :  { %p5138_p7 = pnand %p5136_p6, %p5133_p5 }
 0x715   :  { %5141 = shalt.err (!%p5138_p7)
}
 0x716   :  { %4258 = dma.vmem_to_hbm [thread:$0]  %s4256_s30, 256, %s6954_s14, [#allocation3]  }
 0x717   :  { %5142 = dma.done.wait [#allocation3], 256  }
 0x718   :  { %5143 = vsyncadd [#allocation3], 4294967040 }
 0x719   :  { %4262 = vsyncpa [#allocation3], 1 }

</bundles_post_ra>
